<compile_context>
chip_gen: v5e
topology: v5e:2x2
jax: 0.10.0
libtpu: 0.0.40
codegen_flags: <defaults>
</compile_context>

<pallas_src>
import functools
import math

import jax
import jax.numpy as jnp
import numpy as np
from jax.experimental import pallas as pl
from jax.experimental.pallas import tpu as pltpu


def _round_up(v, m):
    return ((v + m - 1) // m) * m


def _dynamic_conv_fused_kernel(gc_ref, wlin_ref, blin_ref, base_ref, x_ref,
                               o_ref, *, ks, dil, t_pp, t_out, r_blk,
                               inv_temperature):
    """Fused attention-over-kernels + dynamic conv for one (sample, row-chunk).

    gc:   (1, 1, context_dim)        f32   per-sample context vector
    wlin: (context_dim, k)           f32   attention Linear weight
    blin: (1, k)                     f32   attention Linear bias
    base: (k, C_out, ks*ks*C_in)     f32   base kernels, tap-major columns
    x:    (1, C_in, X_len)           bf16  flattened padded input
                                           (row stride t_pp, multiple of 128)
    o:    (1, C_out, r_blk, T_out)         cropped NCHW output rows
    """
    c_in = x_ref.shape[1]
    c_out = o_ref.shape[1]
    k = base_ref.shape[0]

    # --- attention over the k base kernels (tiny; recomputed per grid step so
    # nothing persists across steps and both grid axes stay "parallel") -------
    logits = (jnp.dot(gc_ref[0], wlin_ref[...],
                      preferred_element_type=jnp.float32)
              + blin_ref[...]) * inv_temperature                 # (1, k)
    m = jnp.max(logits, axis=-1, keepdims=True)
    e = jnp.exp(logits - m)
    att = e / jnp.sum(e, axis=-1, keepdims=True)                 # (1, k)

    # per-sample aggregated weight: f32 mixture, bf16 for the MXU operands.
    w = att[:, 0:1] * base_ref[0]
    for j in range(1, k):
        w = w + att[:, j:j + 1] * base_ref[j]                    # (C_out, ks*ks*C_in)
    w = w.astype(jnp.bfloat16)

    # --- dynamic conv for this row-chunk -------------------------------------
    n = r_blk * t_pp                                  # chunk columns (mult of 128)
    c0 = pl.multiple_of(pl.program_id(1) * n, 128)    # lane-aligned chunk start
    w_kw = (r_blk + (ks - 1) * dil) * t_pp            # per-kw-phase slab width
    w_big = w_kw + (ks - 1) * dil                     # full slab incl. kw shifts
    xbig = x_ref[0, :, pl.ds(c0, w_big)]              # one aligned dynamic load

    acc = jnp.zeros((c_out, n), jnp.float32)
    for kw in range(ks):
        # one (possibly) lane-misaligned slice per kw phase, shared by all kh
        xw = xbig[:, kw * dil:kw * dil + w_kw]                   # (C_in, w_kw)
        for kh in range(ks):
            ti = kh * ks + kw
            acc = acc + jnp.dot(
                w[:, ti * c_in:(ti + 1) * c_in],
                xw[:, kh * dil * t_pp:kh * dil * t_pp + n],      # lane-aligned
                preferred_element_type=jnp.float32)

    # --- store the cropped output rows directly (no glue crop pass) ----------
    for r in range(r_blk):
        o_ref[0, :, r, :] = acc[:, r * t_pp:r * t_pp + t_out].astype(o_ref.dtype)


class DynamicConvPallas:
    def __init__(self, in_channels, out_channels, context_dim, kernel_size,
                 stride=1, dilation=1, padding=0, groups=1, att_groups=1,
                 bias=False, k=4, temp_schedule=(30, 1, 1, 0.05),
                 target_chunk_cols=2048, out_dtype=jnp.bfloat16,
                 param_key=None):
        assert in_channels % groups == 0
        assert groups == 1 and att_groups == 1 and (not bias) and stride == 1
        assert target_chunk_cols >= 128

        if param_key is None:
            param_key = jax.random.PRNGKey(0)

        self.in_channels = in_channels
        self.out_channels = out_channels
        self.kernel_size = kernel_size
        self.stride = stride
        self.padding = padding
        self.dilation = dilation
        self.groups = groups
        self.k = k
        self.att_groups = att_groups
        self.T_max, self.T_min, self.T0_slope, self.T1_slope = temp_schedule
        self.temperature = float(self.T_max)
        self.target_chunk_cols = target_chunk_cols
        self.out_dtype = out_dtype

        kw_, kl_, kb_ = jax.random.split(param_key, 3)
        in_cg = in_channels // groups
        # kaiming_normal_(mode='fan_out') applied to each of the k kernels.
        fan_out = out_channels * kernel_size * kernel_size
        std = math.sqrt(2.0 / fan_out)
        self.base_weight = std * jax.random.normal(
            kw_, (k, out_channels, in_cg, kernel_size, kernel_size),
            jnp.float32)
        # Tap-major copy: (k, C_out, kh, kw, C_in) -> (k, C_out, ks*ks*C_in) so
        # the aggregated weight is already in the conv kernel's column layout.
        self.base_perm = jnp.transpose(
            self.base_weight, (0, 1, 3, 4, 2)).reshape(
                k, out_channels, kernel_size * kernel_size * in_cg)
        # nn.Linear(context_dim, k*att_groups) default init.
        lim = 1.0 / math.sqrt(context_dim)
        self.wlin = jax.random.uniform(
            kl_, (context_dim, k * att_groups), jnp.float32, -lim, lim)
        self.blin = jax.random.uniform(
            kb_, (1, k * att_groups), jnp.float32, -lim, lim)

    def update_params(self, epoch):
        t0 = self.T_max - self.T0_slope * epoch
        t1 = (1 + self.T1_slope * (self.T_max - 1) / self.T0_slope
              - self.T1_slope * epoch)
        self.temperature = max(t0, t1, self.T_min)

    @staticmethod
    def _pick_row_block(f_out, t_pp, target_cols):
        """Output-row block per grid step: largest multiple of 8 that divides
        f_out with r*t_pp <= target_cols (falling back to the smallest such
        divisor, or the whole extent if none exists)."""
        best = None
        for r in range(8, f_out + 1, 8):
            if f_out % r:
                continue
            if best is None or r * t_pp <= target_cols:
                best = r
        if best is None:
            # TODO(synk): pad f_out to a multiple of 8 + row-crop in glue if a
            # huge feature map with an awkward row count ever shows up here.
            return f_out
        return best

    def __call__(self, x, g):
        b, c, f, t = x.shape
        assert c == self.in_channels
        ks, dil, p = self.kernel_size, self.dilation, self.padding
        c_in = self.in_channels // self.groups
        c_out = self.out_channels

        f_p, t_p = f + 2 * p, t + 2 * p
        f_out = (f_p - dil * (ks - 1) - 1) // self.stride + 1
        t_out = (t_p - dil * (ks - 1) - 1) // self.stride + 1
        assert f_out > 0 and t_out > 0

        # Lane-aligned flattened row stride: every kh tap offset becomes a
        # multiple of 128 and every chunk start (r_blk*t_pp) is lane-aligned.
        t_pp = _round_up(t_p, 128)
        assert t_pp % 128 == 0
        r_blk = self._pick_row_block(f_out, t_pp, self.target_chunk_cols)
        n_chunks = f_out // r_blk

        # Context vector -> (b, 1, context_dim) so the per-sample block's last
        # two dims equal the full array dims.
        gc = g[0].reshape(b, 1, -1).astype(jnp.float32)
        context_dim = gc.shape[-1]

        # Pad NCHW once, flatten spatial with the padded row stride, tail-pad
        # so the last chunk's kh/kw tap reads stay in bounds. bf16 operands,
        # f32 accumulation in-kernel.
        xp = jnp.pad(x, ((0, 0), (0, 0), (p, p), (p, t_pp - t - p)))
        x_len = _round_up(f_p * t_pp + (ks - 1) * dil, 128)
        xf = xp.reshape(b, c, f_p * t_pp)
        xf = jnp.pad(xf, ((0, 0), (0, 0), (0, x_len - f_p * t_pp)))
        xf = xf.astype(jnp.bfloat16)

        kernel = functools.partial(
            _dynamic_conv_fused_kernel, ks=ks, dil=dil, t_pp=t_pp,
            t_out=t_out, r_blk=r_blk,
            inv_temperature=1.0 / float(self.temperature))

        out = pl.pallas_call(
            kernel,
            grid=(b, n_chunks),
            in_specs=[
                pl.BlockSpec((1, 1, context_dim), lambda i, j: (i, 0, 0)),
                pl.BlockSpec(self.wlin.shape, lambda i, j: (0, 0)),
                pl.BlockSpec(self.blin.shape, lambda i, j: (0, 0)),
                pl.BlockSpec(self.base_perm.shape, lambda i, j: (0, 0, 0)),
                # full per-sample flattened input stays VMEM-resident across
                # the chunk axis (same block index -> no re-DMA per chunk).
                pl.BlockSpec((1, c_in, x_len), lambda i, j: (i, 0, 0)),
            ],
            out_specs=pl.BlockSpec((1, c_out, r_blk, t_out),
                                   lambda i, j: (i, 0, j, 0)),
            out_shape=jax.ShapeDtypeStruct((b, c_out, f_out, t_out),
                                           self.out_dtype),
            # Per-step VMEM use is small (<~2 MiB at typical ESC50 shapes) so
            # the default scoped VMEM limit is left alone; if block sizes are
            # ever raised, keep the limit <= ~48 MiB for v7x (64 MiB physical
            # per TC; v5e/v6e have 128 MiB).
            compiler_params=pltpu.CompilerParams(
                dimension_semantics=("parallel", "parallel")),
        )(gc, self.wlin, self.blin, self.base_perm, xf)
        return out


def _reference_forward(mod, x, g):
    """Pure-JAX f32 reference reproducing the PyTorch forward semantics."""
    b = x.shape[0]
    gc = g[0].reshape(b, -1)
    logits = gc @ mod.wlin + mod.blin
    att = jax.nn.softmax(logits / mod.temperature, axis=-1)
    d = mod.out_channels * (mod.in_channels // mod.groups) * mod.kernel_size ** 2
    aggw = att @ mod.base_weight.reshape(mod.k, d)
    w = aggw.reshape(b, mod.out_channels, mod.in_channels // mod.groups,
                     mod.kernel_size, mod.kernel_size)
    outs = []
    for i in range(b):
        o = jax.lax.conv_general_dilated(
            x[i:i + 1], w[i],
            window_strides=(mod.stride, mod.stride),
            padding=[(mod.padding, mod.padding)] * 2,
            rhs_dilation=(mod.dilation, mod.dilation),
            dimension_numbers=('NCHW', 'OIHW', 'NCHW'))
        outs.append(o)
    return jnp.concatenate(outs, axis=0)


if __name__ == "__main__":
    b, c_in, c_out = 2, 4, 8
    f, t = 16, 16
    context_dim, ks, k = 32, 3, 4

    key = jax.random.PRNGKey(0)
    kx, kg, kp = jax.random.split(key, 3)
    x = jax.random.normal(kx, (b, c_in, f, t), jnp.float32)
    g0 = jax.random.normal(kg, (b, context_dim, 1, 1), jnp.float32)

    # target_chunk_cols=1024 so the small test exercises the row-chunk grid
    # axis (2 chunks per sample) as well as the batch axis.
    mod = DynamicConvPallas(c_in, c_out, context_dim, ks, stride=1,
                            dilation=1, padding=1, groups=1, att_groups=1,
                            bias=False, k=k, target_chunk_cols=1024,
                            param_key=kp)

    out = jax.block_until_ready(mod(x, (g0,)))
    assert out.shape == (b, c_out, f, t), out.shape

    ref = jax.block_until_ready(_reference_forward(mod, x, (g0,)))
    # bf16 operands / bf16 output (f32 accumulation) -> loose-ish tolerance.
    np.testing.assert_allclose(np.asarray(out.astype(jnp.float32)),
                               np.asarray(ref), rtol=2e-2, atol=2e-2)
    print("KERNEL_OK")
</pallas_src>

<mosaic_0001>
module attributes {stable_mosaic.version = 11 : i64} {
  func.func @_dynamic_conv_fused_kernel(%arg0: i32, %arg1: i32, %arg2: memref<1x1x32xf32, #tpu.memory_space<vmem>>, %arg3: memref<32x4xf32, #tpu.memory_space<vmem>>, %arg4: memref<1x4xf32, #tpu.memory_space<vmem>>, %arg5: memref<4x8x36xf32, #tpu.memory_space<vmem>>, %arg6: memref<1x4x2432xbf16, #tpu.memory_space<vmem>>, %arg7: memref<1x8x8x16xbf16, #tpu.memory_space<vmem>>) attributes {dimension_semantics = [#tpu.dimension_semantics<parallel>, #tpu.dimension_semantics<parallel>], iteration_bounds = array<i64: 2, 2>, scalar_prefetch = 0 : i64, scratch_operands = 0 : i64, tpu.core_type = #tpu.core_type<tc>, window_params = [{transform_indices = @transform_0, window_bounds = array<i64: 1, 1, 32>}, {pipeline_mode = #tpu.pipeline_mode<synchronous>, transform_indices = @transform_1, window_bounds = array<i64: 32, 4>}, {pipeline_mode = #tpu.pipeline_mode<synchronous>, transform_indices = @transform_2, window_bounds = array<i64: 1, 4>}, {pipeline_mode = #tpu.pipeline_mode<synchronous>, transform_indices = @transform_3, window_bounds = array<i64: 4, 8, 36>}, {transform_indices = @transform_4, window_bounds = array<i64: 1, 4, 2432>}, {transform_indices = @transform_5, window_bounds = array<i64: 1, 8, 8, 16>}]} {
    %c0 = arith.constant 0 : index
    %c0_0 = arith.constant 0 : index
    %c0_1 = arith.constant 0 : index
    %0 = vector.load %arg2[%c0, %c0_0, %c0_1] : memref<1x1x32xf32, #tpu.memory_space<vmem>>, vector<1x1x32xf32>
    %1 = vector.shape_cast %0 : vector<1x1x32xf32> to vector<1x32xf32>
    %c0_2 = arith.constant 0 : index
    %c0_3 = arith.constant 0 : index
    %2 = vector.load %arg3[%c0_2, %c0_3] : memref<32x4xf32, #tpu.memory_space<vmem>>, vector<32x4xf32>
    %cst = arith.constant dense<0.000000e+00> : vector<1x4xf32>
    %3 = tpu.matmul %1, %2, %cst {dimension_numbers = #tpu.dot_dimension_numbers<[1], [0], [0], [1], [0, 0, 1, 1], [], []>} : vector<1x32xf32>, vector<32x4xf32>, vector<1x4xf32> -> vector<1x4xf32>
    %c0_4 = arith.constant 0 : index
    %c0_5 = arith.constant 0 : index
    %4 = vector.load %arg4[%c0_4, %c0_5] : memref<1x4xf32, #tpu.memory_space<vmem>>, vector<1x4xf32>
    %5 = arith.addf %3, %4 : vector<1x4xf32>
    %cst_6 = arith.constant 0.0333333351 : f32
    %6 = vector.broadcast %cst_6 : f32 to vector<1x4xf32>
    %7 = arith.mulf %5, %6 : vector<1x4xf32>
    %cst_7 = arith.constant dense<0xFF800000> : vector<1xf32>
    %8 = vector.multi_reduction <maximumf>, %7, %cst_7 [1] : vector<1x4xf32> to vector<1xf32>
    %9 = vector.shape_cast %8 : vector<1xf32> to vector<1x1xf32>
    %10 = vector.broadcast %9 : vector<1x1xf32> to vector<1x4xf32>
    %11 = arith.subf %7, %10 : vector<1x4xf32>
    %12 = math.exp %11 : vector<1x4xf32>
    %cst_8 = arith.constant dense<0.000000e+00> : vector<1xf32>
    %13 = vector.multi_reduction <add>, %12, %cst_8 [1] : vector<1x4xf32> to vector<1xf32>
    %14 = vector.shape_cast %13 : vector<1xf32> to vector<1x1xf32>
    %15 = vector.broadcast %14 : vector<1x1xf32> to vector<1x4xf32>
    %16 = arith.divf %12, %15 : vector<1x4xf32>
    %17 = vector.extract_strided_slice %16 {offsets = [0, 0], sizes = [1, 1], strides = [1, 1]} : vector<1x4xf32> to vector<1x1xf32>
    %c0_9 = arith.constant 0 : index
    %c0_10 = arith.constant 0 : index
    %c0_11 = arith.constant 0 : index
    %18 = vector.load %arg5[%c0_9, %c0_10, %c0_11] : memref<4x8x36xf32, #tpu.memory_space<vmem>>, vector<1x8x36xf32>
    %19 = vector.shape_cast %18 : vector<1x8x36xf32> to vector<8x36xf32>
    %20 = vector.broadcast %17 : vector<1x1xf32> to vector<8x36xf32>
    %21 = arith.mulf %20, %19 : vector<8x36xf32>
    %22 = vector.extract_strided_slice %16 {offsets = [0, 1], sizes = [1, 1], strides = [1, 1]} : vector<1x4xf32> to vector<1x1xf32>
    %c1 = arith.constant 1 : index
    %c0_12 = arith.constant 0 : index
    %c0_13 = arith.constant 0 : index
    %23 = vector.load %arg5[%c1, %c0_12, %c0_13] : memref<4x8x36xf32, #tpu.memory_space<vmem>>, vector<1x8x36xf32>
    %24 = vector.shape_cast %23 : vector<1x8x36xf32> to vector<8x36xf32>
    %25 = vector.broadcast %22 : vector<1x1xf32> to vector<8x36xf32>
    %26 = arith.mulf %25, %24 : vector<8x36xf32>
    %27 = arith.addf %21, %26 : vector<8x36xf32>
    %28 = vector.extract_strided_slice %16 {offsets = [0, 2], sizes = [1, 1], strides = [1, 1]} : vector<1x4xf32> to vector<1x1xf32>
    %c2 = arith.constant 2 : index
    %c0_14 = arith.constant 0 : index
    %c0_15 = arith.constant 0 : index
    %29 = vector.load %arg5[%c2, %c0_14, %c0_15] : memref<4x8x36xf32, #tpu.memory_space<vmem>>, vector<1x8x36xf32>
    %30 = vector.shape_cast %29 : vector<1x8x36xf32> to vector<8x36xf32>
    %31 = vector.broadcast %28 : vector<1x1xf32> to vector<8x36xf32>
    %32 = arith.mulf %31, %30 : vector<8x36xf32>
    %33 = arith.addf %27, %32 : vector<8x36xf32>
    %34 = vector.extract_strided_slice %16 {offsets = [0, 3], sizes = [1, 1], strides = [1, 1]} : vector<1x4xf32> to vector<1x1xf32>
    %c3 = arith.constant 3 : index
    %c0_16 = arith.constant 0 : index
    %c0_17 = arith.constant 0 : index
    %35 = vector.load %arg5[%c3, %c0_16, %c0_17] : memref<4x8x36xf32, #tpu.memory_space<vmem>>, vector<1x8x36xf32>
    %36 = vector.shape_cast %35 : vector<1x8x36xf32> to vector<8x36xf32>
    %37 = vector.broadcast %34 : vector<1x1xf32> to vector<8x36xf32>
    %38 = arith.mulf %37, %36 : vector<8x36xf32>
    %39 = arith.addf %33, %38 : vector<8x36xf32>
    %40 = arith.truncf %39 : vector<8x36xf32> to vector<8x36xbf16>
    %c1024_i32 = arith.constant 1024 : i32
    %41 = arith.muli %arg1, %c1024_i32 : i32
    %42 = tpu.assume_multiple %41, 128 : i32
    %c0_18 = arith.constant 0 : index
    %c0_19 = arith.constant 0 : index
    %43 = arith.index_cast %42 : i32 to index
    %44 = vector.load %arg6[%c0_18, %c0_19, %43] : memref<1x4x2432xbf16, #tpu.memory_space<vmem>>, vector<1x4x1282xbf16>
    %45 = vector.shape_cast %44 : vector<1x4x1282xbf16> to vector<4x1282xbf16>
    %cst_20 = arith.constant 0.000000e+00 : f32
    %46 = vector.broadcast %cst_20 : f32 to vector<8x1024xf32>
    %47 = vector.extract_strided_slice %45 {offsets = [0, 0], sizes = [4, 1280], strides = [1, 1]} : vector<4x1282xbf16> to vector<4x1280xbf16>
    %48 = vector.extract_strided_slice %40 {offsets = [0, 0], sizes = [8, 4], strides = [1, 1]} : vector<8x36xbf16> to vector<8x4xbf16>
    %49 = vector.extract_strided_slice %47 {offsets = [0, 0], sizes = [4, 1024], strides = [1, 1]} : vector<4x1280xbf16> to vector<4x1024xbf16>
    %cst_21 = arith.constant dense<0.000000e+00> : vector<8x1024xf32>
    %50 = tpu.matmul %48, %49, %cst_21 {dimension_numbers = #tpu.dot_dimension_numbers<[1], [0], [0], [1], [0, 0, 1, 1], [], []>} : vector<8x4xbf16>, vector<4x1024xbf16>, vector<8x1024xf32> -> vector<8x1024xf32>
    %51 = arith.addf %46, %50 : vector<8x1024xf32>
    %52 = vector.extract_strided_slice %40 {offsets = [0, 12], sizes = [8, 4], strides = [1, 1]} : vector<8x36xbf16> to vector<8x4xbf16>
    %53 = vector.extract_strided_slice %47 {offsets = [0, 128], sizes = [4, 1024], strides = [1, 1]} : vector<4x1280xbf16> to vector<4x1024xbf16>
    %cst_22 = arith.constant dense<0.000000e+00> : vector<8x1024xf32>
    %54 = tpu.matmul %52, %53, %cst_22 {dimension_numbers = #tpu.dot_dimension_numbers<[1], [0], [0], [1], [0, 0, 1, 1], [], []>} : vector<8x4xbf16>, vector<4x1024xbf16>, vector<8x1024xf32> -> vector<8x1024xf32>
    %55 = arith.addf %51, %54 : vector<8x1024xf32>
    %56 = vector.extract_strided_slice %40 {offsets = [0, 24], sizes = [8, 4], strides = [1, 1]} : vector<8x36xbf16> to vector<8x4xbf16>
    %57 = vector.extract_strided_slice %47 {offsets = [0, 256], sizes = [4, 1024], strides = [1, 1]} : vector<4x1280xbf16> to vector<4x1024xbf16>
    %cst_23 = arith.constant dense<0.000000e+00> : vector<8x1024xf32>
    %58 = tpu.matmul %56, %57, %cst_23 {dimension_numbers = #tpu.dot_dimension_numbers<[1], [0], [0], [1], [0, 0, 1, 1], [], []>} : vector<8x4xbf16>, vector<4x1024xbf16>, vector<8x1024xf32> -> vector<8x1024xf32>
    %59 = arith.addf %55, %58 : vector<8x1024xf32>
    %60 = vector.extract_strided_slice %45 {offsets = [0, 1], sizes = [4, 1280], strides = [1, 1]} : vector<4x1282xbf16> to vector<4x1280xbf16>
    %61 = vector.extract_strided_slice %40 {offsets = [0, 4], sizes = [8, 4], strides = [1, 1]} : vector<8x36xbf16> to vector<8x4xbf16>
    %62 = vector.extract_strided_slice %60 {offsets = [0, 0], sizes = [4, 1024], strides = [1, 1]} : vector<4x1280xbf16> to vector<4x1024xbf16>
    %cst_24 = arith.constant dense<0.000000e+00> : vector<8x1024xf32>
    %63 = tpu.matmul %61, %62, %cst_24 {dimension_numbers = #tpu.dot_dimension_numbers<[1], [0], [0], [1], [0, 0, 1, 1], [], []>} : vector<8x4xbf16>, vector<4x1024xbf16>, vector<8x1024xf32> -> vector<8x1024xf32>
    %64 = arith.addf %59, %63 : vector<8x1024xf32>
    %65 = vector.extract_strided_slice %40 {offsets = [0, 16], sizes = [8, 4], strides = [1, 1]} : vector<8x36xbf16> to vector<8x4xbf16>
    %66 = vector.extract_strided_slice %60 {offsets = [0, 128], sizes = [4, 1024], strides = [1, 1]} : vector<4x1280xbf16> to vector<4x1024xbf16>
    %cst_25 = arith.constant dense<0.000000e+00> : vector<8x1024xf32>
    %67 = tpu.matmul %65, %66, %cst_25 {dimension_numbers = #tpu.dot_dimension_numbers<[1], [0], [0], [1], [0, 0, 1, 1], [], []>} : vector<8x4xbf16>, vector<4x1024xbf16>, vector<8x1024xf32> -> vector<8x1024xf32>
    %68 = arith.addf %64, %67 : vector<8x1024xf32>
    %69 = vector.extract_strided_slice %40 {offsets = [0, 28], sizes = [8, 4], strides = [1, 1]} : vector<8x36xbf16> to vector<8x4xbf16>
    %70 = vector.extract_strided_slice %60 {offsets = [0, 256], sizes = [4, 1024], strides = [1, 1]} : vector<4x1280xbf16> to vector<4x1024xbf16>
    %cst_26 = arith.constant dense<0.000000e+00> : vector<8x1024xf32>
    %71 = tpu.matmul %69, %70, %cst_26 {dimension_numbers = #tpu.dot_dimension_numbers<[1], [0], [0], [1], [0, 0, 1, 1], [], []>} : vector<8x4xbf16>, vector<4x1024xbf16>, vector<8x1024xf32> -> vector<8x1024xf32>
    %72 = arith.addf %68, %71 : vector<8x1024xf32>
    %73 = vector.extract_strided_slice %45 {offsets = [0, 2], sizes = [4, 1280], strides = [1, 1]} : vector<4x1282xbf16> to vector<4x1280xbf16>
    %74 = vector.extract_strided_slice %40 {offsets = [0, 8], sizes = [8, 4], strides = [1, 1]} : vector<8x36xbf16> to vector<8x4xbf16>
    %75 = vector.extract_strided_slice %73 {offsets = [0, 0], sizes = [4, 1024], strides = [1, 1]} : vector<4x1280xbf16> to vector<4x1024xbf16>
    %cst_27 = arith.constant dense<0.000000e+00> : vector<8x1024xf32>
    %76 = tpu.matmul %74, %75, %cst_27 {dimension_numbers = #tpu.dot_dimension_numbers<[1], [0], [0], [1], [0, 0, 1, 1], [], []>} : vector<8x4xbf16>, vector<4x1024xbf16>, vector<8x1024xf32> -> vector<8x1024xf32>
    %77 = arith.addf %72, %76 : vector<8x1024xf32>
    %78 = vector.extract_strided_slice %40 {offsets = [0, 20], sizes = [8, 4], strides = [1, 1]} : vector<8x36xbf16> to vector<8x4xbf16>
    %79 = vector.extract_strided_slice %73 {offsets = [0, 128], sizes = [4, 1024], strides = [1, 1]} : vector<4x1280xbf16> to vector<4x1024xbf16>
    %cst_28 = arith.constant dense<0.000000e+00> : vector<8x1024xf32>
    %80 = tpu.matmul %78, %79, %cst_28 {dimension_numbers = #tpu.dot_dimension_numbers<[1], [0], [0], [1], [0, 0, 1, 1], [], []>} : vector<8x4xbf16>, vector<4x1024xbf16>, vector<8x1024xf32> -> vector<8x1024xf32>
    %81 = arith.addf %77, %80 : vector<8x1024xf32>
    %82 = vector.extract_strided_slice %40 {offsets = [0, 32], sizes = [8, 4], strides = [1, 1]} : vector<8x36xbf16> to vector<8x4xbf16>
    %83 = vector.extract_strided_slice %73 {offsets = [0, 256], sizes = [4, 1024], strides = [1, 1]} : vector<4x1280xbf16> to vector<4x1024xbf16>
    %cst_29 = arith.constant dense<0.000000e+00> : vector<8x1024xf32>
    %84 = tpu.matmul %82, %83, %cst_29 {dimension_numbers = #tpu.dot_dimension_numbers<[1], [0], [0], [1], [0, 0, 1, 1], [], []>} : vector<8x4xbf16>, vector<4x1024xbf16>, vector<8x1024xf32> -> vector<8x1024xf32>
    %85 = arith.addf %81, %84 : vector<8x1024xf32>
    %86 = vector.extract_strided_slice %85 {offsets = [0, 0], sizes = [8, 16], strides = [1, 1]} : vector<8x1024xf32> to vector<8x16xf32>
    %87 = arith.truncf %86 : vector<8x16xf32> to vector<8x16xbf16>
    %c0_30 = arith.constant 0 : index
    %c0_31 = arith.constant 0 : index
    %c0_32 = arith.constant 0 : index
    %c0_33 = arith.constant 0 : index
    %88 = vector.load %arg7[%c0_30, %c0_31, %c0_32, %c0_33] : memref<1x8x8x16xbf16, #tpu.memory_space<vmem>>, vector<1x8x1x16xbf16>
    %89 = vector.shape_cast %88 : vector<1x8x1x16xbf16> to vector<8x16xbf16>
    %90 = vector.shape_cast %87 : vector<8x16xbf16> to vector<1x8x1x16xbf16>
    tpu.vector_store %arg7[%c0_30, %c0_31, %c0_32, %c0_33], %90 {strides = array<i32>} : memref<1x8x8x16xbf16, #tpu.memory_space<vmem>>, vector<1x8x1x16xbf16>,
    %91 = vector.extract_strided_slice %85 {offsets = [0, 128], sizes = [8, 16], strides = [1, 1]} : vector<8x1024xf32> to vector<8x16xf32>
    %92 = arith.truncf %91 : vector<8x16xf32> to vector<8x16xbf16>
    %c0_34 = arith.constant 0 : index
    %c0_35 = arith.constant 0 : index
    %c1_36 = arith.constant 1 : index
    %c0_37 = arith.constant 0 : index
    %93 = vector.load %arg7[%c0_34, %c0_35, %c1_36, %c0_37] : memref<1x8x8x16xbf16, #tpu.memory_space<vmem>>, vector<1x8x1x16xbf16>
    %94 = vector.shape_cast %93 : vector<1x8x1x16xbf16> to vector<8x16xbf16>
    %95 = vector.shape_cast %92 : vector<8x16xbf16> to vector<1x8x1x16xbf16>
    tpu.vector_store %arg7[%c0_34, %c0_35, %c1_36, %c0_37], %95 {strides = array<i32>} : memref<1x8x8x16xbf16, #tpu.memory_space<vmem>>, vector<1x8x1x16xbf16>,
    %96 = vector.extract_strided_slice %85 {offsets = [0, 256], sizes = [8, 16], strides = [1, 1]} : vector<8x1024xf32> to vector<8x16xf32>
    %97 = arith.truncf %96 : vector<8x16xf32> to vector<8x16xbf16>
    %c0_38 = arith.constant 0 : index
    %c0_39 = arith.constant 0 : index
    %c2_40 = arith.constant 2 : index
    %c0_41 = arith.constant 0 : index
    %98 = vector.load %arg7[%c0_38, %c0_39, %c2_40, %c0_41] : memref<1x8x8x16xbf16, #tpu.memory_space<vmem>>, vector<1x8x1x16xbf16>
    %99 = vector.shape_cast %98 : vector<1x8x1x16xbf16> to vector<8x16xbf16>
    %100 = vector.shape_cast %97 : vector<8x16xbf16> to vector<1x8x1x16xbf16>
    tpu.vector_store %arg7[%c0_38, %c0_39, %c2_40, %c0_41], %100 {strides = array<i32>} : memref<1x8x8x16xbf16, #tpu.memory_space<vmem>>, vector<1x8x1x16xbf16>,
    %101 = vector.extract_strided_slice %85 {offsets = [0, 384], sizes = [8, 16], strides = [1, 1]} : vector<8x1024xf32> to vector<8x16xf32>
    %102 = arith.truncf %101 : vector<8x16xf32> to vector<8x16xbf16>
    %c0_42 = arith.constant 0 : index
    %c0_43 = arith.constant 0 : index
    %c3_44 = arith.constant 3 : index
    %c0_45 = arith.constant 0 : index
    %103 = vector.load %arg7[%c0_42, %c0_43, %c3_44, %c0_45] : memref<1x8x8x16xbf16, #tpu.memory_space<vmem>>, vector<1x8x1x16xbf16>
    %104 = vector.shape_cast %103 : vector<1x8x1x16xbf16> to vector<8x16xbf16>
    %105 = vector.shape_cast %102 : vector<8x16xbf16> to vector<1x8x1x16xbf16>
    tpu.vector_store %arg7[%c0_42, %c0_43, %c3_44, %c0_45], %105 {strides = array<i32>} : memref<1x8x8x16xbf16, #tpu.memory_space<vmem>>, vector<1x8x1x16xbf16>,
    %106 = vector.extract_strided_slice %85 {offsets = [0, 512], sizes = [8, 16], strides = [1, 1]} : vector<8x1024xf32> to vector<8x16xf32>
    %107 = arith.truncf %106 : vector<8x16xf32> to vector<8x16xbf16>
    %c0_46 = arith.constant 0 : index
    %c0_47 = arith.constant 0 : index
    %c4 = arith.constant 4 : index
    %c0_48 = arith.constant 0 : index
    %108 = vector.load %arg7[%c0_46, %c0_47, %c4, %c0_48] : memref<1x8x8x16xbf16, #tpu.memory_space<vmem>>, vector<1x8x1x16xbf16>
    %109 = vector.shape_cast %108 : vector<1x8x1x16xbf16> to vector<8x16xbf16>
    %110 = vector.shape_cast %107 : vector<8x16xbf16> to vector<1x8x1x16xbf16>
    tpu.vector_store %arg7[%c0_46, %c0_47, %c4, %c0_48], %110 {strides = array<i32>} : memref<1x8x8x16xbf16, #tpu.memory_space<vmem>>, vector<1x8x1x16xbf16>,
    %111 = vector.extract_strided_slice %85 {offsets = [0, 640], sizes = [8, 16], strides = [1, 1]} : vector<8x1024xf32> to vector<8x16xf32>
    %112 = arith.truncf %111 : vector<8x16xf32> to vector<8x16xbf16>
    %c0_49 = arith.constant 0 : index
    %c0_50 = arith.constant 0 : index
    %c5 = arith.constant 5 : index
    %c0_51 = arith.constant 0 : index
    %113 = vector.load %arg7[%c0_49, %c0_50, %c5, %c0_51] : memref<1x8x8x16xbf16, #tpu.memory_space<vmem>>, vector<1x8x1x16xbf16>
    %114 = vector.shape_cast %113 : vector<1x8x1x16xbf16> to vector<8x16xbf16>
    %115 = vector.shape_cast %112 : vector<8x16xbf16> to vector<1x8x1x16xbf16>
    tpu.vector_store %arg7[%c0_49, %c0_50, %c5, %c0_51], %115 {strides = array<i32>} : memref<1x8x8x16xbf16, #tpu.memory_space<vmem>>, vector<1x8x1x16xbf16>,
    %116 = vector.extract_strided_slice %85 {offsets = [0, 768], sizes = [8, 16], strides = [1, 1]} : vector<8x1024xf32> to vector<8x16xf32>
    %117 = arith.truncf %116 : vector<8x16xf32> to vector<8x16xbf16>
    %c0_52 = arith.constant 0 : index
    %c0_53 = arith.constant 0 : index
    %c6 = arith.constant 6 : index
    %c0_54 = arith.constant 0 : index
    %118 = vector.load %arg7[%c0_52, %c0_53, %c6, %c0_54] : memref<1x8x8x16xbf16, #tpu.memory_space<vmem>>, vector<1x8x1x16xbf16>
    %119 = vector.shape_cast %118 : vector<1x8x1x16xbf16> to vector<8x16xbf16>
    %120 = vector.shape_cast %117 : vector<8x16xbf16> to vector<1x8x1x16xbf16>
    tpu.vector_store %arg7[%c0_52, %c0_53, %c6, %c0_54], %120 {strides = array<i32>} : memref<1x8x8x16xbf16, #tpu.memory_space<vmem>>, vector<1x8x1x16xbf16>,
    %121 = vector.extract_strided_slice %85 {offsets = [0, 896], sizes = [8, 16], strides = [1, 1]} : vector<8x1024xf32> to vector<8x16xf32>
    %122 = arith.truncf %121 : vector<8x16xf32> to vector<8x16xbf16>
    %c0_55 = arith.constant 0 : index
    %c0_56 = arith.constant 0 : index
    %c7 = arith.constant 7 : index
    %c0_57 = arith.constant 0 : index
    %123 = vector.load %arg7[%c0_55, %c0_56, %c7, %c0_57] : memref<1x8x8x16xbf16, #tpu.memory_space<vmem>>, vector<1x8x1x16xbf16>
    %124 = vector.shape_cast %123 : vector<1x8x1x16xbf16> to vector<8x16xbf16>
    %125 = vector.shape_cast %122 : vector<8x16xbf16> to vector<1x8x1x16xbf16>
    tpu.vector_store %arg7[%c0_55, %c0_56, %c7, %c0_57], %125 {strides = array<i32>} : memref<1x8x8x16xbf16, #tpu.memory_space<vmem>>, vector<1x8x1x16xbf16>,
    return
  }
  func.func @transform_0(%arg0: i32, %arg1: i32) -> (i32, i32, i32) {
    %c0_i32 = arith.constant 0 : i32
    %c0_i32_0 = arith.constant 0 : i32
    %c0_i32_1 = arith.constant 0 : i32
    return %arg0, %c0_i32, %c0_i32_0 : i32, i32, i32
  }
  func.func @transform_1(%arg0: i32, %arg1: i32) -> (i32, i32) {
    %c0_i32 = arith.constant 0 : i32
    %c0_i32_0 = arith.constant 0 : i32
    %c0_i32_1 = arith.constant 0 : i32
    return %c0_i32, %c0_i32_0 : i32, i32
  }
  func.func @transform_2(%arg0: i32, %arg1: i32) -> (i32, i32) {
    %c0_i32 = arith.constant 0 : i32
    %c0_i32_0 = arith.constant 0 : i32
    %c0_i32_1 = arith.constant 0 : i32
    return %c0_i32, %c0_i32_0 : i32, i32
  }
  func.func @transform_3(%arg0: i32, %arg1: i32) -> (i32, i32, i32) {
    %c0_i32 = arith.constant 0 : i32
    %c0_i32_0 = arith.constant 0 : i32
    %c0_i32_1 = arith.constant 0 : i32
    %c0_i32_2 = arith.constant 0 : i32
    return %c0_i32, %c0_i32_0, %c0_i32_1 : i32, i32, i32
  }
  func.func @transform_4(%arg0: i32, %arg1: i32) -> (i32, i32, i32) {
    %c0_i32 = arith.constant 0 : i32
    %c0_i32_0 = arith.constant 0 : i32
    %c0_i32_1 = arith.constant 0 : i32
    return %arg0, %c0_i32, %c0_i32_0 : i32, i32, i32
  }
  func.func @transform_5(%arg0: i32, %arg1: i32) -> (i32, i32, i32, i32) {
    %c0_i32 = arith.constant 0 : i32
    %c0_i32_0 = arith.constant 0 : i32
    %c0_i32_1 = arith.constant 0 : i32
    return %arg0, %c0_i32, %arg1, %c0_i32_0 : i32, i32, i32, i32
  }
}

</mosaic_0001>

<bundles_post_ra>
// kernel: tpu_custom_call.1
= control target key start
LH: loop header
LB: loop body
LE: loop exit
PB: predicated region body
PF: predicated region fallthrough
CT: control target
= control target key end

     0   :  { %10 = vsyncpa [#allocation3], 0  ;;  %s4565_s0 = inlined_call_operand.vmem [shape: f32[2,1,32], index: 0, kind: input, shape index: {}]   ;;  %s4566_s1 = inlined_call_operand.vmem [shape: f32[32,4], index: 1, kind: input, shape index: {}]   ;;  %s4567_s2 = inlined_call_operand.vmem [shape: f32[1,4], index: 2, kind: input, shape index: {}]   ;;  %s4568_s3 = inlined_call_operand.vmem [shape: f32[4,8,36], index: 3, kind: input, shape index: {}]   ;;  %s4569_s4 = inlined_call_operand.hbm [shape: bf16[2,4,2432], index: 4, kind: input, shape index: {}]   ;;  %s4570_s5 = inlined_call_operand.hbm [shape: bf16[2,8,16,16], index: 5, kind: output, shape index: {}]  }
   0x1   :  { %12 = vsyncpa [#allocation3 + $0x1], 0 }
   0x2   :  { %13 = vsyncpa [#allocation4], 0 }
   0x3   :  { %15 = vsyncpa [#allocation4 + $0x1], 0  ;;  %s3289_s18 = smov 0   ;;  %s3291_s19 = smov 0  }
   0x4   :  { %s3293_s20 = smov 0   ;;  %s3295_s21 = smov 0  }
   0x5   :  { %s3297_s22 = smov 0   ;;  %s3299_s23 = smov 0  }
   0x6   :  { %s3301_s24 = smov 0   ;;  %s3303_s25 = smov 0  }
   0x7   :  { %s3305_s26 = smov 0   ;;  %s3307_s27 = smov 0  }
   0x8   :  { %s3309_s28 = smov 0  }
   0x9 LB: > { %4576 = sst [smem:[#allocation8_spill]] %s3222_s23  ;;  %s2836_s29 = sadd.s32 4294967295, %s3242_s28   ;;  %s3242_s28 = sphi %s3309_s28, %s21_s28   ;;  %s3238_s27 = sphi %s3307_s27, %s4607_s27   ;;  %s3234_s26 = sphi %s3305_s26, %s4606_s26   ;;  %s3230_s25 = sphi %s3303_s25, %s4605_s25   ;;  %s3226_s24 = sphi %s3301_s24, %s4604_s24   ;;  %s3222_s23 = sphi %s3299_s23, %s4603_s23   ;;  %s3218_s22 = sphi %s3297_s22, %s4612_s22   ;;  %s3214_s21 = sphi %s3295_s21, %s4611_s21   ;;  %s3210_s20 = sphi %s3293_s20, %s4610_s20   ;;  %s3206_s19 = sphi %s3291_s19, %s4609_s19   ;;  %s3202_s18 = sphi %s3289_s18, %s4608_s18  }
   0xa   : > { %4577 = sst [smem:[#allocation9_spill]] %s3234_s26  ;;  %s2837_s30 = sadd.s32 4294967294, %s3242_s28  }
   0xb   : > { %4578 = sst [smem:[#allocation10_spill]] %s3238_s27  ;;  %s30_s6 = sadd.s32 1, %s3234_s26 }
   0xc   : > { %s33_s7 = sadd.s32 1, %s3238_s27  ;;  %p31_p0 = scmp.ge.s32.totalorder %s30_s6, 2 }
   0xd   : > { %s129_s8 = sadd.s32 1, %s3222_s23  ;;  %p136_p1 = scmp.ne.s32.totalorder %s3222_s23, %s3218_s22 }
   0xe   : > { %p137_p2 = scmp.eq.s32.totalorder %s3242_s28, 0  ;;  %s4614_s6 = smov (%p31_p0, %s30_s6), 0 }
   0xf   : > { %4579 = sst [smem:[#allocation11_spill]] %s4614_s6  ;;  %s4616_s7 = smov (!%p31_p0, %s33_s7), %s3238_s27 }
  0x10   : > { %p3353_p3 = por %p137_p2, %p136_p1  ;;  %p142_p4 = scmp.ne.s32.totalorder %s3218_s22, %s3214_s21 }
  0x11   : > { %p35_p5 = scmp.ge.s32.totalorder %s4616_s7, 2  ;;  %p143_p6 = scmp.eq.s32.totalorder %s2836_s29, 0 }
  0x12   : > { %s153_s10 = ssub.s32 %s3234_s26, %s4614_s6  ;;  %s157_s11 = sadd.s32 1, %s3210_s20 }
  0x13   : > { %s4618_s7 = smov (%p35_p5, %s4616_s7), 0  ;;  %p3363_p7 = por %p143_p6, %p142_p4 }
  0x14   : > { %4581 = sst [smem:[#allocation12_spill]] %s4618_s7  ;;  %p167_p8 = scmp.ne.s32.totalorder %s3210_s20, %s3206_s19 }
  0x15   : > { %s126_s13 = ssub.s32 %s3238_s27, %s4618_s7  ;;  %p168_p9 = scmp.eq.s32.totalorder %s2836_s29, 3 }
  0x16   : > { %p127_p10 = scmp.eq.s32.totalorder %s126_s13, 0  ;;  %s154_s14 = sor.u32 %s153_s10, %s126_s13 }
  0x17   : > { %p155_p11 = scmp.eq.s32.totalorder %s154_s14, 0  ;;  %p3371_p12 = por %p168_p9, %p167_p8 }
  0x18   : > { %s3376_s16 = scalar_select %p127_p10, %s3222_s23, %s129_s8  }
  0x19   : > { %s3379_s17 = scalar_select %p155_p11, %s3210_s20, %s157_s11  }
  0x1a   : > { %4584 = sst [smem:[#allocation13_spill]] %s3376_s16  ;;  %p173_p13 = scmp.ne.s32.totalorder %s3206_s19, %s3202_s18 }
  0x1b   : > { %p174_p0 = scmp.eq.s32.totalorder %s2837_s30, 3  ;;  %p2981_p1 = scmp.lt.s32.totalorder %s3242_s28, 4 }
  0x1c   : > { %s209_s29 = sand.u32 1, %s3222_s23   ;;  %s2959_s10 = smul.u32 38, %s3238_s27 }
  0x1d   : > { %p3384_p2 = por %p174_p0, %p173_p13  ;;  %s2958_s7 = smul.u32 38, %s209_s29 }
  0x1e   : > { %p2974_p4 = pnand %p2981_p1, %p3353_p3  ;;  %p2841_p5 = scmp.ge.s32.totalorder %s3242_s28, 1 }
  0x1f   : > { %s218_s8 = scalar_lea.hbm %s4569_s4, %s2959_s10  ;;  %s213_s11 = scalar_lea.vmem [#allocation2], %s2958_s7 }
  0x20   : > { %s222_s6 = sshll.u32 %s213_s11, 4  ;;  %s220_s26 = sshll.u32 %s218_s8, 4  ;;  %s223_s6 = int_to_ptr.vmem [resolvable:$true] %s222_s6  ;;  %s221_s26 = int_to_ptr.hbm [resolvable:$true] %s220_s26 }
  0x21   : > { %s210_s30 = scalar_lea.sflag [#allocation3], %s209_s29  ;;  %p227_p6 = scmp.lt.s32.totalorder %s3242_s28, 5 }
  0x22   : > { %2976 = dma.hbm_to_vmem [thread:$0]  (!%p2974_p4), %s221_s26, 608, %s223_s6, %s210_s30  }
  0x23   : > { %p228_p8 = pnand %p2841_p5, %p227_p6 }
  0x24   : > { %s233_s27 = sand.u32 (!%p228_p8), 1, %s3218_s22  }
  0x25   : > { %231 = sbr.rel (%p228_p8) target bundleno = 1202 (0x4b2), region = 40  ;;  %s234_s16 = scalar_lea.sflag (!%p228_p8), [#allocation3], %s233_s27 }
  0x26   : > { %s3398_s9 = smul.u32 (!%p228_p8), 38, %s233_s27 }
  0x28   : > { %s237_s23 = scalar_lea.vmem (!%p228_p8), [#allocation2], %s3398_s9 }
  0x2a   : > { %3193 = dma.done.wait (%p3363_p7), %s234_s16, 608  }
  0x2b   : > { %3195 = vsyncadd (%p3363_p7), %s234_s16, 4294966688  ;;  %p268_p3 = scmp.lt.s32.totalorder %s3230_s25, 1  ;;  %v276_v0 = vld [vmem:[%s4566_s1 + $0x18] sm:$0xff]  ;;  %v275_v1 = vld [vmem:[%s4566_s1 + $0x10] sm:$0xff]  ;;  %vm278_vm0 = vcmask 261120   ;;  %vm303_vm1 = vcmask 24576  }
  0x2c   : > { %294 = vmatpush.msra.mxu0 %v276_v0  ;;  %v274_v2 = vld [vmem:[%s4566_s1 + $0x8] sm:$0xff]  ;;  %v273_v3 = vld [vmem:[%s4566_s1] sm:$0xff]  ;;  %s3245_s7 = smov 127   ;;  %s3246_s29 = smov 126   ;;  %vm394_vm6 = vcmask 1041408   ;;  %vm390_vm7 = vcmask 31744  }
  0x2d   : > { %s269_s26 = scalar_select %p268_p3, %s3230_s25, 1  ;;  %v277_v5 = vld [vmem:[%s4567_s2] sm:$0x1]  ;;  %v2844_v61 = vld [vmem:[%s4568_s3 + $0x8] sm:$0xff]  ;;  %vm836_vm8 = vcmask 1039360   ;;  %vm1404_vm9 = vcmask 1031168  }
  0x2e   : > { %295 = vmatpush.msra.mxu0 %v275_v1  ;;  %s2847_s10 = sshll.u32 %s3226_s24, 10  ;;  %v328_v63 = vld [vmem:[%s4568_s3] sm:$0xff]  ;;  %s3250_s12 = smov 112   ;;  %vm1933_vm10 = vcmask 1040384   ;;  %vm1938_vm11 = vcmask 1041409   ;;  %vm1942_vm12 = vcmask 1042434  }
  0x2f   : > { %s270_s16 = scalar_lea.vmem %s4565_s0, %s269_s26  ;;  %s3244_s26 = smov 125   ;;  %vm1946_vm13 = vcmask 1043459   ;;  %vm2006_vm14 = vcmask 122880   ;;  %vm2007_vm15 = vsmask.f32 256 }
  0x30   : > { %296 = vmatpush.msra.mxu0 %v274_v2  ;;  %v272_v4 = vld [vmem:[%s270_s16] sm:$0x1]  ;;  %s363_s27 = sshra.s32 %s2847_s10, 7  ;;  %s3251_s16 = smov 100  }
  0x31   : > { %s2848_s13 = sshll.u32 %s363_s27, 1  ;;  %s3253_s8 = smov 108  }
  0x32   : > { %297 = vmatpush.msra.mxu0 %v273_v3  ;;  %s366_s14 = scalar_lea.vmem %s237_s23, %s2848_s13 [#allocation2]  ;;  %v2845_v3 = vld [vmem:[%s4568_s3 + $0x10] sm:$0xff]  ;;  %s3254_s11 = smov 96  }
  0x33   : > { %2843 = vmatmul.msk.f32.vlgmr.msra.gmra.mxu0 %vm278_vm0, %v272_v4  ;;  %v3430_v27 = vld [vmem:[%s366_s14] sm:$0xff]  ;;  %v3433_v28 = vld [vmem:[%s366_s14 + $0x10] sm:$0x3f]  ;;  %v3454_v40 = vld [vmem:[%s366_s14 + $0x8] sm:$0xff]  ;;  %s3247_s14 = smov 124  }
  0x34   : > { %376 = vst [vmem:[#allocation1] ss:$4 sm:$0xff] %v3430_v27  ;;  %vm3992_vm0 = vmand %vm2006_vm14, %vm2007_vm15  ;;  %vm2499_vm15 = vsmask.f32 7946 }
  0x35   : > { %379 = vst [vmem:[#allocation1 + $0x20] ss:$4 sm:$0xff] %v3454_v40 }
  0x3b   : > { %v3435_v29 = vld.sshfl [vmem:[#allocation1 + $0x8] sm:$0xff pattern:$0x73625140]  ;;  %v3437_v30 = vld.sshfl [vmem:[#allocation1 + $0x10] sm:$0xff pattern:$0x73625140] }
  0x3c   : > { %v3439_v31 = vld.sshfl [vmem:[#allocation1 + $0x18] sm:$0xff pattern:$0x73625140]  ;;  %v3462_v43 = vld.sshfl [vmem:[#allocation1 + $0x20] sm:$0xff pattern:$0x73625140] }
  0x3d   : > { %388 = vst [vmem:[#allocation1] ss:$4 sm:$0xff] %v3433_v28  ;;  %v3464_v44 = vld.sshfl [vmem:[#allocation1 + $0x28] sm:$0xff pattern:$0x73625140] }
  0x3e   : > { %v3466_v45 = vld.sshfl [vmem:[#allocation1 + $0x30] sm:$0xff pattern:$0x73625140]  ;;  %v3468_v46 = vld.sshfl [vmem:[#allocation1 + $0x38] sm:$0xff pattern:$0x73625140] }
  0x3f   : > { %517 = vst [vmem:[#allocation1 + $0x20] ss:$4 sm:$0xff] %v3454_v40 }
  0x44   : > { %v3442_v33 = vld.sshfl [vmem:[#allocation1] sm:$0xff pattern:$0x73625140] }
  0x45   : > { %515 = vst [vmem:[#allocation1] ss:$4 sm:$0xff] %v3430_v27 }
  0x46   : > { %v3477_v50 = vld.sshfl [vmem:[#allocation1 + $0x20] sm:$0xff pattern:$0x73625140]  ;;  %v3479_v51 = vld.sshfl [vmem:[#allocation1 + $0x28] sm:$0xff pattern:$0x73625140] }
  0x47   : > { %v3481_v52 = vld.sshfl [vmem:[#allocation1 + $0x30] sm:$0xff pattern:$0x73625140]  ;;  %v3483_v53 = vld.sshfl [vmem:[#allocation1 + $0x38] sm:$0xff pattern:$0x73625140] }
  0x48   : > { %653 = vst [vmem:[#allocation1 + $0x20] ss:$4 sm:$0xff] %v3454_v40 }
  0x4c   : > { %v3445_v36 = vld.sshfl [vmem:[#allocation1] sm:$0xff pattern:$0x73625140]  ;;  %v3447_v37 = vld.sshfl [vmem:[#allocation1 + $0x8] sm:$0xff pattern:$0x73625140] }
  0x4d   : > { %v3449_v38 = vld.sshfl [vmem:[#allocation1 + $0x10] sm:$0xff pattern:$0x73625140]  ;;  %v3451_v39 = vld.sshfl [vmem:[#allocation1 + $0x18] sm:$0xff pattern:$0x73625140] }
  0x4e   : > { %651 = vst [vmem:[#allocation1] ss:$4 sm:$0xff] %v3430_v27 }
  0x4f   : > { %v3486_v55 = vld.sshfl [vmem:[#allocation1 + $0x20] sm:$0xff pattern:$0x73625140]  ;;  %v3488_v56 = vld.sshfl [vmem:[#allocation1 + $0x28] sm:$0xff pattern:$0x73625140] }
  0x50   : > { %v3490_v57 = vld.sshfl [vmem:[#allocation1 + $0x30] sm:$0xff pattern:$0x73625140]  ;;  %v3492_v58 = vld.sshfl [vmem:[#allocation1 + $0x38] sm:$0xff pattern:$0x73625140] }
  0x51   : > { %798 = vst [vmem:[#allocation1 + $0x20] ss:$4 sm:$0xff] %v3454_v40 }
  0x55   : > { %v3457_v41 = vld.sshfl [vmem:[#allocation1 + $0x10] sm:$0xff pattern:$0x73625140]  ;;  %v3459_v42 = vld.sshfl [vmem:[#allocation1 + $0x18] sm:$0xff pattern:$0x73625140] }
  0x56   : > { %660 = vst [vmem:[#allocation1] ss:$4 sm:$0xff] %v3433_v28 }
  0x5d   : > { %v3470_v47 = vld.sshfl [vmem:[#allocation1] sm:$0xff pattern:$0x73625140]  ;;  %v3472_v48 = vld.sshfl [vmem:[#allocation1 + $0x8] sm:$0xff pattern:$0x73625140] }
  0x5e   : > { %796 = vst [vmem:[#allocation1] ss:$4 sm:$0xff] %v3430_v27 }
  0x65   : > { %v803_v49 = vld.sshfl [vmem:[#allocation1 + $0x10] sm:$0xff pattern:$0x73625140]  ;;  %v799_v54 = vld.sshfl [vmem:[#allocation1] sm:$0xff pattern:$0x73625140] }
  0x66   : > { %v801_v59 = vld.sshfl [vmem:[#allocation1 + $0x8] sm:$0xff pattern:$0x73625140]  ;;  %v805_v60 = vld.sshfl [vmem:[#allocation1 + $0x18] sm:$0xff pattern:$0x73625140] }
  0x67   : > { %815 = vst [vmem:[#allocation1] ss:$4 sm:$0xff] %v3433_v28 }
  0x6e   : > { %v816_v2 = vld.sshfl [vmem:[#allocation1] sm:$0xff pattern:$0x73625140] }
  0x6f   : > { %986 = vst [vmem:[#allocation1] ss:$4 sm:$0xff] %v3430_v27 }
  0xb0   : > { %v299_v6 = vpop.f32.mrf.mxu0 }
  0xb1   : > { %v300_v7 = vadd.f32 %v299_v6, %v277_v5  ;;  %v2846_v6 = vld [vmem:[%s4568_s3 + $0x18] sm:$0xff] }
  0xb3   : > { %v302_v8 = vmul.f32 0.033333335, %v300_v7 }
  0xb5   : > { %v304_v9 = vsel %vm303_vm1, %v302_v8, -inf }
  0xb6   : > { %305 = vmax.xlane.f32.xlu0 %v304_v9 }
 0x129   : > { %v306_v10 = vpop.xlane.xlu0 %305 }
 0x12a   : > { %v307_v11 = vsub.f32 %v302_v8, %v306_v10 }
 0x12c   : > { %v308_v12 = vmul.f32 1.442695, %v307_v11 }
 0x12e   : > { %3086 = vpow2.f32 %v308_v12  ;;  %v809_v12 = vld.sshfl [vmem:[#allocation1 + $0x28] sm:$0xff pattern:$0x73625140] }
 0x134   : > { %v3087_v13 = vpop.eup %3086 }
 0x135   : > { %v310_v14 = vsel %vm303_vm1, %v3087_v13, 0.0  ;;  %vm2105_vm1 = vsmask.f32 7938 }
 0x136   : > { %311 = vadd.xlane.f32.xlu0 %v310_v14 }
 0x1a9   : > { %v312_v15 = vpop.xlane.xlu0 %311 }
 0x1aa   : > { %3088 = vrcp.f32 %v312_v15  ;;  %v324_v19 = vand.u32 2147483648, %v312_v15  ;;  %v322_v21 = vand.u32 2147483647, %v312_v15  ;;  %vm318_vm3 = vweird.f32 %v312_v15 }
 0x1ac   : > { %v325_v23 = vor.u32 1.1754944e-38, %v324_v19  ;;  %vm323_vm5 = vcmp.eq.f32.partialorder %v322_v21, 8.507059e+37 }
 0x1b0   : > { %v3089_v16 = vpop.eup %3088 }
 0x1b1   : > { %v314_v17 = vmul.f32 %v3089_v16, %v312_v15  ;;  %vm319_vm2 = vweird.f32 %v3089_v16  ;;  %v813_v15 = vld.sshfl [vmem:[#allocation1 + $0x38] sm:$0xff pattern:$0x73625140] }
 0x1b2   : > { %vm320_vm4 = vmor %vm318_vm3, %vm319_vm2  ;;  %vm2203_vm2 = vcmask 123905   ;;  %vm2204_vm3 = vsmask.f32 1280 }
 0x1b3   : > { %v315_v18 = vsub.f32 1.0, %v314_v17  ;;  %v993_v17 = vld.sshfl [vmem:[#allocation1 + $0x18] sm:$0xff pattern:$0x73625140] }
 0x1b5   : > { %v316_v20 = vmul.f32 %v3089_v16, %v315_v18  ;;  %v807_v18 = vld.sshfl [vmem:[#allocation1 + $0x20] sm:$0xff pattern:$0x73625140] }
 0x1b7   : > { %v317_v22 = vadd.f32 %v3089_v16, %v316_v20  ;;  %v989_v20 = vld.sshfl [vmem:[#allocation1 + $0x8] sm:$0xff pattern:$0x73625140] }
 0x1b9   : > { %v321_v24 = vsel %vm320_vm4, %v3089_v16, %v317_v22  ;;  %v991_v16 = vld.sshfl [vmem:[#allocation1 + $0x10] sm:$0xff pattern:$0x73625140]  ;;  %vm4086_vm4 = vmand %vm2006_vm14, %vm2105_vm1  ;;  %vm2598_vm1 = vsmask.f32 3328 }
 0x1ba   : > { %v326_v25 = vsel %vm323_vm5, %v325_v23, %v321_v24  ;;  %1003 = vst [vmem:[#allocation1] ss:$4 sm:$0xff] %v3433_v28  ;;  %vm2400_vm5 = vcmask 124930  }
 0x1bb   : > { %v327_v26 = vmul.f32 %v3087_v13, %v326_v25  ;;  %v811_v13 = vld.sshfl [vmem:[#allocation1 + $0x30] sm:$0xff pattern:$0x73625140] }
 0x1bc   : > { %988 = vst [vmem:[#allocation1 + $0x20] ss:$4 sm:$0xff] %v3454_v40 }
 0x1bd   : > { %354 = vrot.lane.b32.xlu2 %v327_v26, %s3244_s26  ;;  %336 = vrot.lane.b32.xlu1 %v327_v26, %s3245_s7  ;;  %2961 = vpush %v327_v26 }
 0x1c1   : > { %v1004_v24 = vld.sshfl [vmem:[#allocation1] sm:$0xff pattern:$0x73625140] }
 0x1c3   : > { %v1001_v23 = vld.sshfl [vmem:[#allocation1 + $0x38] sm:$0xff pattern:$0x73625140]  ;;  %v997_v25 = vld.sshfl [vmem:[#allocation1 + $0x28] sm:$0xff pattern:$0x73625140] }
 0x1c5   : > { %345 = vrot.lane.b32.xlu1 %v327_v26, %s3246_s29  ;;  %v999_v26 = vld.sshfl [vmem:[#allocation1 + $0x30] sm:$0xff pattern:$0x73625140] }
 0x1cd   : > { %822 = vrot.lane.b32.xlu1 %v803_v49, %s3245_s7 }
 0x1ee   : > { %s2962_s23 = spop %2961 }
 0x1ef   : > { %v331_v0 = vstv %s2962_s23  ;;  %s3248_s23 = smov 104  }
 0x1f0   : > { %v333_v4 = vmul.f32 %v331_v0, %v328_v63 }
 0x217   : > { %v355_v35 = vpop.permute.xlu2 %354 }
 0x22f   : > { %v337_v32 = vpop.permute.xlu1 %336 }
 0x230   : > { %2963 = vpush %v337_v32  ;;  %v995_v32 = vld.sshfl [vmem:[#allocation1 + $0x20] sm:$0xff pattern:$0x73625140] }
 0x231   : > { %1177 = vst [vmem:[#allocation1 + $0x20] ss:$4 sm:$0xff] %v3454_v40 }
 0x237   : > { %v346_v34 = vpop.permute.xlu1 %345 }
 0x238   : > { %2965 = vpush %v346_v34  ;;  %v1006_v34 = vld.sshfl [vmem:[#allocation1 + $0x8] sm:$0xff pattern:$0x73625140]  ;;  %v1182_v63 = vld.sshfl [vmem:[#allocation1 + $0x20] sm:$0xff pattern:$0x73625140] }
 0x239   : > { %2967 = vpush %v355_v35  ;;  %v1188_v0 = vld.sshfl [vmem:[#allocation1 + $0x38] sm:$0xff pattern:$0x73625140] }
 0x23a   : > { %1175 = vst [vmem:[#allocation1] ss:$4 sm:$0xff] %v3430_v27 }
 0x241   : > { %v1178_v35 = vld.sshfl [vmem:[#allocation1 + $0x10] sm:$0xff pattern:$0x73625140]  ;;  %v1180_v49 = vld.sshfl [vmem:[#allocation1 + $0x18] sm:$0xff pattern:$0x73625140] }
 0x242   : > { %1190 = vst [vmem:[#allocation1] ss:$4 sm:$0xff] %v3433_v28 }
 0x261   : > { %s2964_s9 = spop %2963 }
 0x262   : > { %v339_v62 = vstv %s2964_s9  ;;  %s3249_s9 = smov 116  }
 0x263   : > { %v341_v1 = vmul.f32 %v2844_v61, %v339_v62  ;;  %v1195_v61 = vld.sshfl [vmem:[#allocation1 + $0x10] sm:$0xff pattern:$0x73625140] }
 0x264   : > { %v1186_v62 = vld.sshfl [vmem:[#allocation1 + $0x30] sm:$0xff pattern:$0x73625140] }
 0x265   : > { %v342_v7 = vadd.f32 %v341_v1, %v333_v4 }
 0x269   : > { %s2966_s26 = spop %2965 }
 0x26a   : > { %v348_v5 = vstv %s2966_s26  ;;  %s2968_s13 = spop %2967  ;;  %s2954_s26 = sshll.u32 %s3230_s25, 4 }
 0x26b   : > { %v350_v8 = vmul.f32 %v2845_v3, %v348_v5  ;;  %v357_v9 = vstv %s2968_s13  ;;  %v395_v5 = vsel %vm394_vm6, %v3435_v29, 0  ;;  %v407_v29 = vsel %vm394_vm6, %v3468_v46, 0  ;;  %s2733_s10 = sadd.s32 %s3226_s24, %s2954_s26 }
 0x26c   : > { %v359_v11 = vmul.f32 %v2846_v6, %v357_v9  ;;  %v397_v6 = vsel %vm394_vm6, %v3437_v30, 0  ;;  %418 = vmatpush.bf16.msra.mxu1 %v395_v5  ;;  %v409_v46 = vsel %vm394_vm6, %v3442_v33, 0  ;;  %s2955_s24 = sshll.u32 %s2733_s10, 2 }
 0x26d   : > { %v351_v10 = vadd.f32 %v350_v8, %v342_v7  ;;  %v399_v7 = vsel %vm394_vm6, %v3439_v31, 0  ;;  %v401_v8 = vsel %vm394_vm6, %v3462_v43, 0  ;;  %431 = vmatpush.bf16.msra.mxu2 %v397_v6  ;;  %v403_v31 = vsel %vm394_vm6, %v3464_v44, 0  ;;  %s4470_s13 = scalar_lea.hbm %s4570_s5, %s2955_s24 }
 0x26e   : > { %444 = vmatpush.bf16.msra.mxu3 %v399_v7  ;;  %457 = vmatpush.bf16.msrb.mxu0 %v401_v8  ;;  %v405_v43 = vsel %vm394_vm6, %v3466_v45, 0 }
 0x26f   : > { %v360_v14 = vadd.f32 %v359_v11, %v351_v10 }
 0x270   : > { %470 = vmatpush.bf16.msrb.mxu1 %v403_v31 }
 0x271   : > { %v3509_v19 = vpack.c.bf16 %v360_v14, %v360_v14  ;;  %483 = vmatpush.bf16.msrb.mxu2 %v405_v43  ;;  %v533_v14 = vsel %vm394_vm6, %v3449_v38, 0  ;;  %v539_v38 = vsel %vm394_vm6, %v3479_v51, 0  ;;  %v670_v51 = vsel %vm394_vm6, %v3486_v55, 0 }
 0x272   : > { %496 = vmatpush.bf16.msrb.mxu3 %v407_v29  ;;  %509 = vmatpush.bf16.msra.mxu0 %v409_v46 }
 0x273   : > { %v371_v21 = vunpack.c.l.b16 %v3509_v19 }
 0x275   : > { %v3514_v22 = vpack.c.b16 %v371_v21, %v371_v21 }
 0x277   : > { %794 = vrot.lane.b32.xlu1 %v3514_v22, %s3247_s14  ;;  %649 = vrot.lane.b32.xlu0 %v3514_v22, %s3248_s23  ;;  %s2738_s23 = sshll.u32 %s4470_s13, 4  ;;  %s2739_s23 = int_to_ptr.hbm [resolvable:$true] %s2738_s23 }
 0x278   : > { %373 = vrot.lane.b32.xlu2 %v3514_v22, %s3249_s9 }
 0x27f   : > { %820 = vrot.lane.b32.xlu1 %v801_v59, %s3245_s7  ;;  %830 = vrot.lane.b32.xlu0 %v811_v13, %s3245_s7  ;;  %v1184_v59 = vld.sshfl [vmem:[#allocation1 + $0x28] sm:$0xff pattern:$0x73625140] }
 0x280   : > { %824 = vrot.lane.b32.xlu2 %v805_v60, %s3245_s7  ;;  %v1191_v60 = vld.sshfl [vmem:[#allocation1] sm:$0xff pattern:$0x73625140]  ;;  %1366 = vst [vmem:[#allocation1 + $0x20] ss:$4 sm:$0xff] %v3454_v40 }
 0x287   : > { %832 = vrot.lane.b32.xlu1 %v813_v15, %s3245_s7  ;;  %834 = vrot.lane.b32.xlu0 %v816_v2, %s3245_s7  ;;  %v1379_v44 = vld.sshfl [vmem:[#allocation1 + $0x30] sm:$0xff pattern:$0x73625140]  ;;  %v1381_v9 = vld.sshfl [vmem:[#allocation1 + $0x38] sm:$0xff pattern:$0x73625140] }
 0x288   : > { %818 = vrot.lane.b32.xlu2 %v799_v54, %s3245_s7  ;;  %v1193_v54 = vld.sshfl [vmem:[#allocation1 + $0x8] sm:$0xff pattern:$0x73625140]  ;;  %v1375_v45 = vld.sshfl [vmem:[#allocation1 + $0x20] sm:$0xff pattern:$0x73625140] }
 0x289   : > { %1364 = vst [vmem:[#allocation1] ss:$4 sm:$0xff] %v3430_v27  ;;  %v1377_v10 = vld.sshfl [vmem:[#allocation1 + $0x28] sm:$0xff pattern:$0x73625140]  ;;  %v529_v15 = vsel %vm394_vm6, %v3445_v36, 0 }
 0x28a   : > { %1556 = vst [vmem:[#allocation1 + $0x20] ss:$4 sm:$0xff] %v3454_v40  ;;  %v541_v36 = vsel %vm394_vm6, %v3481_v52, 0  ;;  %v823_v52 = vpop.permute.xlu1 %822 }
 0x28f   : > { %1012 = vrot.lane.b32.xlu1 %v993_v17, %s3245_s7  ;;  %984 = vrot.lane.b32.xlu0 %v3514_v22, %s3250_s12  ;;  %v535_v17 = vsel %vm394_vm6, %v3451_v39, 0  ;;  %v543_v39 = vsel %vm394_vm6, %v3483_v53, 0  ;;  %v666_v53 = vsel %vm394_vm6, %v3457_v41, 0  ;;  %s3134_s12 = sshra.s32 %s2739_s23, 4  ;;  %s3135_s12 = int_to_ptr.hbm [resolvable:$true] %s3134_s12 }
 0x290   : > { %826 = vrot.lane.b32.xlu2 %v807_v18, %s3245_s7  ;;  %v1371_v1 = vld.sshfl [vmem:[#allocation1 + $0x10] sm:$0xff pattern:$0x73625140]  ;;  %v1373_v2 = vld.sshfl [vmem:[#allocation1 + $0x18] sm:$0xff pattern:$0x73625140]  ;;  %p3141_p11 = scmp.lt.s32.totalorder %s3135_s12, %s4570_s5 }
 0x291   : > { %v1367_v3 = vld.sshfl [vmem:[#allocation1] sm:$0xff pattern:$0x73625140]  ;;  %v1369_v4 = vld.sshfl [vmem:[#allocation1 + $0x8] sm:$0xff pattern:$0x73625140] }
 0x292   : > { %1383 = vst [vmem:[#allocation1] ss:$4 sm:$0xff] %v3433_v28  ;;  %v668_v18 = vsel %vm394_vm6, %v3459_v42, 0 }
 0x297   : > { %1008 = vrot.lane.b32.xlu1 %v989_v20, %s3245_s7  ;;  %1016 = vrot.lane.b32.xlu0 %v997_v25, %s3245_s7  ;;  %v672_v20 = vsel %vm394_vm6, %v3488_v56, 0  ;;  %v678_v56 = vsel %vm394_vm6, %v3470_v47, 0  ;;  %v674_v25 = vsel %vm394_vm6, %v3490_v57, 0 }
 0x298   : > { %828 = vrot.lane.b32.xlu2 %v809_v12, %s3245_s7 }
 0x299   : > { %v1384_v30 = vld.sshfl [vmem:[#allocation1] sm:$0xff pattern:$0x73625140] }
 0x29a   : > { %1554 = vst [vmem:[#allocation1] ss:$4 sm:$0xff] %v3430_v27 }
 0x29f   : > { %1020 = vrot.lane.b32.xlu1 %v1001_v23, %s3245_s7  ;;  %1018 = vrot.lane.b32.xlu0 %v999_v26, %s3245_s7  ;;  %v676_v23 = vsel %vm394_vm6, %v3492_v58, 0  ;;  %v1565_v26 = vld.sshfl [vmem:[#allocation1 + $0x28] sm:$0xff pattern:$0x73625140] }
 0x2a0   : > { %1014 = vrot.lane.b32.xlu2 %v995_v32, %s3245_s7 }
 0x2a1   : > { %v1561_v33 = vld.sshfl [vmem:[#allocation1 + $0x18] sm:$0xff pattern:$0x73625140]  ;;  %v1557_v11 = vld.sshfl [vmem:[#allocation1 + $0x8] sm:$0xff pattern:$0x73625140] }
 0x2a2   : > { %v3576_v12 = vld.sshfl [vmem:[#allocation1 + $0x10] sm:$0xff pattern:$0x73625140] }
 0x2a3   : > { %1571 = vst [vmem:[#allocation1] ss:$4 sm:$0xff] %v3433_v28 }
 0x2a7   : > { %1024 = vrot.lane.b32.xlu1 %v1006_v34, %s3245_s7  ;;  %1203 = vrot.lane.b32.xlu0 %v1184_v59, %s3245_s7 }
 0x2a8   : > { %1010 = vrot.lane.b32.xlu2 %v991_v16, %s3245_s7  ;;  %v531_v16 = vsel %vm394_vm6, %v3447_v37, 0  ;;  %v537_v37 = vsel %vm394_vm6, %v3477_v50, 0  ;;  %v1569_v50 = vld.sshfl [vmem:[#allocation1 + $0x38] sm:$0xff pattern:$0x73625140] }
 0x2aa   : > { %v1574_v55 = vld.sshfl [vmem:[#allocation1 + $0x8] sm:$0xff pattern:$0x73625140] }
 0x2af   : > { %1173 = vrot.lane.b32.xlu1 %v3514_v22, %s3251_s16  ;;  %1199 = vrot.lane.b32.xlu0 %v1180_v49, %s3245_s7  ;;  %s3136_s16 = scalar_lea.hbm %s3135_s12, 32 }
 0x2b0   : > { %1022 = vrot.lane.b32.xlu2 %v1004_v24, %s3245_s7  ;;  %p3137_p7 = scmp.ne.s32.totalorder %s3135_s12, %s3136_s16 }
 0x2b2   : > { %p3138_p9 = pnand %p3137_p7, %p3371_p12 }
 0x2b4   : > { %p3139_p10 = pneg %p3138_p9 }
 0x2b7   : > { %1205 = vrot.lane.b32.xlu1 %v1186_v62, %s3245_s7  ;;  %1211 = vrot.lane.b32.xlu0 %v1193_v54, %s3245_s7 }
 0x2b8   : > { %1201 = vrot.lane.b32.xlu2 %v1182_v63, %s3245_s7 }
 0x2bf   : > { %1207 = vrot.lane.b32.xlu1 %v1188_v0, %s3245_s7  ;;  %1390 = vrot.lane.b32.xlu0 %v1371_v1, %s3246_s29  ;;  %v1567_v0 = vld.sshfl [vmem:[#allocation1 + $0x30] sm:$0xff pattern:$0x73625140]  ;;  %v1563_v1 = vld.sshfl [vmem:[#allocation1 + $0x20] sm:$0xff pattern:$0x73625140] }
 0x2c0   : > { %1197 = vrot.lane.b32.xlu2 %v1178_v35, %s3245_s7  ;;  %1745 = vst [vmem:[#allocation1 + $0x20] ss:$4 sm:$0xff] %v3454_v40 }
 0x2c7   : > { %1392 = vrot.lane.b32.xlu1 %v1373_v2, %s3246_s29  ;;  %1386 = vrot.lane.b32.xlu0 %v1367_v3, %s3246_s29  ;;  %v1752_v43 = vld.sshfl [vmem:[#allocation1 + $0x28] sm:$0xff pattern:$0x73625140] }
 0x2c8   : > { %1209 = vrot.lane.b32.xlu2 %v1191_v60, %s3245_s7 }
 0x2cf   : > { %1388 = vrot.lane.b32.xlu1 %v1369_v4, %s3246_s29  ;;  %1398 = vrot.lane.b32.xlu0 %v1379_v44, %s3246_s29 }
 0x2d0   : > { %1213 = vrot.lane.b32.xlu2 %v1195_v61, %s3245_s7  ;;  %s3252_s7 = smov 120  }
 0x2d2   : > { %v374_v13 = vpop.permute.xlu2 %373 }
 0x2d3   : > { %2849 = vmatmul.msk.bf16.vlgmr.msra.gmra.mxu1 %vm390_vm7, %v374_v13  ;;  %2850 = vmatmul.msk.bf16.vlgmr.msra.gmra.mxu2 %vm390_vm7, %v374_v13 }
 0x2d4   : > { %2851 = vmatmul.msk.bf16.vlgmr.msra.gmra.mxu3 %vm390_vm7, %v374_v13  ;;  %2852 = vmatmul.msk.bf16.vlgmr.msrb.gmra.mxu0 %vm390_vm7, %v374_v13 }
 0x2d5   : > { %578 = vmatpush.bf16.msra.mxu3 %v533_v14  ;;  %552 = vmatpush.bf16.msra.mxu1 %v529_v15 }
 0x2d6   : > { %565 = vmatpush.bf16.msra.mxu2 %v531_v16  ;;  %591 = vmatpush.bf16.msrb.mxu0 %v535_v17 }
 0x2d7   : > { %1400 = vrot.lane.b32.xlu1 %v1381_v9, %s3246_s29  ;;  %1402 = vrot.lane.b32.xlu0 %v1384_v30, %s3246_s29  ;;  %v1754_v9 = vld.sshfl [vmem:[#allocation1 + $0x30] sm:$0xff pattern:$0x73625140] }
 0x2d8   : > { %1362 = vrot.lane.b32.xlu2 %v3514_v22, %s3252_s7 }
 0x2da   : > { %v825_v41 = vpop.permute.xlu2 %824 }
 0x2db   : > { %v839_v57 = vsel %vm836_vm8, %v823_v52, %v825_v41 }
 0x2dc   : > { %v855_v49 = vsel %vm394_vm6, %v839_v57, 0 }
 0x2df   : > { %1580 = vrot.lane.b32.xlu1 %v1561_v33, %s3246_s29  ;;  %1552 = vrot.lane.b32.xlu0 %v3514_v22, %s3253_s8 }
 0x2e0   : > { %1394 = vrot.lane.b32.xlu2 %v1375_v45, %s3246_s29  ;;  %v1572_v45 = vld.sshfl [vmem:[#allocation1] sm:$0xff pattern:$0x73625140] }
 0x2e1   : > { %1743 = vst [vmem:[#allocation1] ss:$4 sm:$0xff] %v3430_v27 }
 0x2e2   : > { %v819_v42 = vpop.permute.xlu2 %818 }
 0x2e3   : > { %2853 = vmatmul.msk.bf16.vlgmr.msrb.gmra.mxu1 %vm390_vm7, %v374_v13  ;;  %2854 = vmatmul.msk.bf16.vlgmr.msrb.gmra.mxu2 %vm390_vm7, %v374_v13 }
 0x2e4   : > { %2855 = vmatmul.msk.bf16.vlgmr.msrb.gmra.mxu3 %vm390_vm7, %v374_v13  ;;  %2856 = vmatmul.msk.bf16.vlgmr.msra.gmra.mxu0 %vm390_vm7, %v374_v13 }
 0x2e5   : > { %630 = vmatpush.bf16.msrb.mxu3 %v541_v36  ;;  %604 = vmatpush.bf16.msrb.mxu1 %v537_v37 }
 0x2e6   : > { %617 = vmatpush.bf16.msrb.mxu2 %v539_v38  ;;  %643 = vmatpush.bf16.msra.mxu0 %v543_v39  ;;  %v1756_v39 = vld.sshfl [vmem:[#allocation1 + $0x38] sm:$0xff pattern:$0x73625140] }
 0x2e7   : > { %1576 = vrot.lane.b32.xlu1 %v1557_v11, %s3246_s29  ;;  %1584 = vrot.lane.b32.xlu0 %v1565_v26, %s3246_s29 }
 0x2e8   : > { %1396 = vrot.lane.b32.xlu2 %v1377_v10, %s3246_s29  ;;  %v1748_v27 = vld.sshfl [vmem:[#allocation1 + $0x18] sm:$0xff pattern:$0x73625140] }
 0x2e9   : > { %v3629_v21 = vpop.permute.xlu1 %794  ;;  %v650_v24 = vpop.permute.xlu0 %649 }
 0x2ea   : > { %v827_v58 = vpop.permute.xlu2 %826 }
 0x2eb   : > { %v840_v35 = vsel %vm836_vm8, %v825_v41, %v827_v58 }
 0x2ec   : > { %v858_v60 = vsel %vm394_vm6, %v840_v35, 0 }
 0x2ef   : > { %1588 = vrot.lane.b32.xlu1 %v1569_v50, %s3246_s29  ;;  %1586 = vrot.lane.b32.xlu0 %v1567_v0, %s3246_s29  ;;  %v1746_v50 = vld.sshfl [vmem:[#allocation1 + $0x10] sm:$0xff pattern:$0x73625140] }
 0x2f0   : > { %1582 = vrot.lane.b32.xlu2 %v1563_v1, %s3246_s29  ;;  %1758 = vst [vmem:[#allocation1] ss:$4 sm:$0xff] %v3433_v28 }
 0x2f1   : > { %v821_v47 = vpop.permute.xlu1 %820  ;;  %v831_v32 = vpop.permute.xlu0 %830 }
 0x2f2   : > { %v829_v62 = vpop.permute.xlu2 %828 }
 0x2f3   : > { %2857 = vmatmul.msk.bf16.vlgmr.msra.gmra.mxu1 %vm390_vm7, %v3509_v19  ;;  %2858 = vmatmul.msk.bf16.vlgmr.msra.gmra.mxu2 %vm390_vm7, %v3509_v19  ;;  %v841_v2 = vsel %vm836_vm8, %v827_v58, %v829_v62  ;;  %v842_v3 = vsel %vm836_vm8, %v829_v62, %v831_v32 }
 0x2f4   : > { %2859 = vmatmul.msk.bf16.vlgmr.msra.gmra.mxu3 %vm390_vm7, %v3509_v19  ;;  %2860 = vmatmul.msk.bf16.vlgmr.msrb.gmra.mxu0 %vm390_vm7, %v3509_v19  ;;  %v861_v8 = vsel %vm394_vm6, %v841_v2, 0  ;;  %v864_v29 = vsel %vm394_vm6, %v842_v3, 0 }
 0x2f5   : > { %715 = vmatpush.bf16.msra.mxu3 %v670_v51  ;;  %689 = vmatpush.bf16.msra.mxu1 %v666_v53 }
 0x2f6   : > { %702 = vmatpush.bf16.msra.mxu2 %v668_v18  ;;  %728 = vmatpush.bf16.msrb.mxu0 %v672_v20 }
 0x2f7   : > { %1592 = vrot.lane.b32.xlu1 %v1574_v55, %s3246_s29  ;;  %1771 = vrot.lane.b32.xlu0 %v1752_v43, %s3246_s29  ;;  %v1759_v26 = vld.sshfl [vmem:[#allocation1] sm:$0xff pattern:$0x73625140] }
 0x2f8   : > { %1578 = vrot.lane.b32.xlu2 %v3576_v12, %s3246_s29 }
 0x2f9   : > { %v833_v34 = vpop.permute.xlu1 %832  ;;  %v835_v54 = vpop.permute.xlu0 %834 }
 0x2fa   : > { %v1015_v4 = vpop.permute.xlu2 %1014  ;;  %v843_v5 = vsel %vm836_vm8, %v831_v32, %v833_v34  ;;  %v844_v6 = vsel %vm836_vm8, %v833_v34, %v835_v54  ;;  %v1763_v54 = vld.sshfl [vmem:[#allocation1 + $0x10] sm:$0xff pattern:$0x73625140] }
 0x2fb   : > { %v867_v30 = vsel %vm394_vm6, %v843_v5, 0  ;;  %v870_v31 = vsel %vm394_vm6, %v844_v6, 0 }
 0x2ff   : > { %1741 = vrot.lane.b32.xlu1 %v3514_v22, %s3254_s11  ;;  %v680_v22 = vsel %vm394_vm6, %v3472_v48, 0  ;;  %v838_v48 = vsel %vm836_vm8, %v821_v47, %v823_v52  ;;  %1767 = vrot.lane.b32.xlu0 %v1748_v27, %s3246_s29  ;;  %v1750_v52 = vld.sshfl [vmem:[#allocation1 + $0x20] sm:$0xff pattern:$0x73625140]  ;;  %s3140_s11 = scalar_lea.hbm %s4570_s5, 128 }
 0x300   : > { %v852_v59 = vsel %vm394_vm6, %v838_v48, 0  ;;  %1590 = vrot.lane.b32.xlu2 %v1572_v45, %s3246_s29  ;;  %p3142_p13 = scmp.lt.s32.totalorder %s3140_s11, %s3136_s16 }
 0x301   : > { %v1013_v63 = vpop.permute.xlu1 %1012  ;;  %v3668_v7 = vpop.permute.xlu0 %984 }
 0x302   : > { %v1011_v46 = vpop.permute.xlu2 %1010  ;;  %v1028_v33 = vsel %vm836_vm8, %v1013_v63, %v1015_v4  ;;  %p3143_p0 = por %p3142_p13, %p3141_p11 }
 0x303   : > { %2861 = vmatmul.msk.bf16.vlgmr.msrb.gmra.mxu1 %vm390_vm7, %v3509_v19  ;;  %2862 = vmatmul.msk.bf16.vlgmr.msrb.gmra.mxu2 %vm390_vm7, %v3509_v19  ;;  %v1027_v11 = vsel %vm836_vm8, %v1011_v46, %v1013_v63  ;;  %v1044_v12 = vsel %vm394_vm6, %v1028_v33, 0 }
 0x304   : > { %2863 = vmatmul.msk.bf16.vlgmr.msrb.gmra.mxu3 %vm390_vm7, %v3509_v19  ;;  %2864 = vmatmul.msk.bf16.vlgmr.msra.gmra.mxu0 %vm390_vm7, %v3509_v19  ;;  %v837_v19 = vsel %vm836_vm8, %v819_v42, %v821_v47  ;;  %v1041_v15 = vsel %vm394_vm6, %v1027_v11, 0  ;;  %p3144_p1 = pnand %p3143_p0, %p3139_p10 }
 0x305   : > { %767 = vmatpush.bf16.msrb.mxu3 %v678_v56  ;;  %754 = vmatpush.bf16.msrb.mxu2 %v676_v23  ;;  %v849_v61 = vsel %vm394_vm6, %v837_v19, 0  ;;  %v1761_v56 = vld.sshfl [vmem:[#allocation1 + $0x8] sm:$0xff pattern:$0x73625140] }
 0x306   : > { %741 = vmatpush.bf16.msrb.mxu1 %v674_v25  ;;  %780 = vmatpush.bf16.msra.mxu0 %v680_v22 }
 0x307   : > { %1773 = vrot.lane.b32.xlu1 %v1754_v9, %s3246_s29  ;;  %1779 = vrot.lane.b32.xlu0 %v1761_v56, %s3246_s29 }
 0x308   : > { %1769 = vrot.lane.b32.xlu2 %v1750_v52, %s3246_s29 }
 0x309   : > { %v1009_v40 = vpop.permute.xlu1 %1008  ;;  %v1017_v44 = vpop.permute.xlu0 %1016 }
 0x30a   : > { %v1026_v13 = vsel %vm836_vm8, %v1009_v40, %v1011_v46  ;;  %v1029_v14 = vsel %vm836_vm8, %v1015_v4, %v1017_v44  ;;  %v1023_v36 = vpop.permute.xlu2 %1022 }
 0x30b   : > { %v1038_v16 = vsel %vm394_vm6, %v1026_v13, 0  ;;  %v1047_v17 = vsel %vm394_vm6, %v1029_v14, 0 }
 0x30f   : > { %1775 = vrot.lane.b32.xlu1 %v1756_v39, %s3246_s29 }
 0x310   : > { %1765 = vrot.lane.b32.xlu2 %v1746_v50, %s3246_s29 }
 0x311   : > { %v1021_v10 = vpop.permute.xlu1 %1020  ;;  %v1019_v37 = vpop.permute.xlu0 %1018 }
 0x312   : > { %v1202_v51 = vpop.permute.xlu2 %1201  ;;  %v1030_v53 = vsel %vm836_vm8, %v1017_v44, %v1019_v37  ;;  %v1031_v18 = vsel %vm836_vm8, %v1019_v37, %v1021_v10  ;;  %v1032_v55 = vsel %vm836_vm8, %v1021_v10, %v1023_v36 }
 0x313   : > { %2865 = vmatmul.msk.bf16.vlgmr.msra.gmra.mxu1 %vm390_vm7, %v650_v24  ;;  %2866 = vmatmul.msk.bf16.vlgmr.msra.gmra.mxu2 %vm390_vm7, %v650_v24  ;;  %v1050_v23 = vsel %vm394_vm6, %v1030_v53, 0  ;;  %v1053_v28 = vsel %vm394_vm6, %v1031_v18, 0 }
 0x314   : > { %2867 = vmatmul.msk.bf16.vlgmr.msra.gmra.mxu3 %vm390_vm7, %v650_v24  ;;  %2868 = vmatmul.msk.bf16.vlgmr.msrb.gmra.mxu0 %vm390_vm7, %v650_v24 }
 0x315   : > { %892 = vmatpush.bf16.msra.mxu2 %v852_v59  ;;  %905 = vmatpush.bf16.msra.mxu3 %v855_v49 }
 0x316   : > { %918 = vmatpush.bf16.msrb.mxu0 %v858_v60  ;;  %879 = vmatpush.bf16.msra.mxu1 %v849_v61 }
 0x318   : > { %1777 = vrot.lane.b32.xlu2 %v1759_v26, %s3246_s29 }
 0x319   : > { %v1025_v38 = vpop.permute.xlu1 %1024  ;;  %v1204_v20 = vpop.permute.xlu0 %1203 }
 0x31a   : > { %v1033_v41 = vsel %vm836_vm8, %v1023_v36, %v1025_v38  ;;  %v1198_v22 = vpop.permute.xlu2 %1197  ;;  %v1217_v32 = vsel %vm836_vm8, %v1202_v51, %v1204_v20 }
 0x31b   : > { %v1059_v25 = vsel %vm394_vm6, %v1033_v41, 0  ;;  %v1233_v49 = vsel %vm394_vm6, %v1217_v32, 0 }
 0x320   : > { %1781 = vrot.lane.b32.xlu2 %v1763_v54, %s3246_s29  ;;  %s265_s29 = sand.u32 1, %s3206_s19  }
 0x321   : > { %v3708_v42 = vpop.permute.xlu1 %1173  ;;  %v1200_v47 = vpop.permute.xlu0 %1199  ;;  %s2842_s30 = sshll.u32 %s265_s29, 5  ;;  %s2723_s9 = scalar_lea.sflag [#allocation4], %s265_s29 }
 0x322   : > { %v1216_v57 = vsel %vm836_vm8, %v1200_v47, %v1202_v51  ;;  %v1215_v48 = vsel %vm836_vm8, %v1198_v22, %v1200_v47  ;;  %v1210_v35 = vpop.permute.xlu2 %1209  ;;  %s3996_s6 = scalar_lea.vmem [#allocation5], %s2842_s30 }
 0x323   : > { %2869 = vmatmul.msk.bf16.vlgmr.msrb.gmra.mxu1 %vm390_vm7, %v650_v24  ;;  %2870 = vmatmul.msk.bf16.vlgmr.msrb.gmra.mxu2 %vm390_vm7, %v650_v24  ;;  %v1230_v59 = vsel %vm394_vm6, %v1216_v57, 0  ;;  %v1227_v60 = vsel %vm394_vm6, %v1215_v48, 0  ;;  %s2736_s14 = sshll.u32 %s3996_s6, 4  ;;  %s4500_s14 = int_to_ptr.vmem [resolvable:$true] %s2736_s14 }
 0x324   : > { %2871 = vmatmul.msk.bf16.vlgmr.msrb.gmra.mxu3 %vm390_vm7, %v650_v24  ;;  %2872 = vmatmul.msk.bf16.vlgmr.msra.gmra.mxu0 %vm390_vm7, %v650_v24  ;;  %v1056_v24 = vsel %vm394_vm6, %v1032_v55, 0 }
 0x325   : > { %931 = vmatpush.bf16.msrb.mxu1 %v861_v8  ;;  %944 = vmatpush.bf16.msrb.mxu2 %v864_v29 }
 0x326   : > { %957 = vmatpush.bf16.msrb.mxu3 %v867_v30  ;;  %970 = vmatpush.bf16.msra.mxu0 %v870_v31 }
 0x329   : > { %v1206_v58 = vpop.permute.xlu1 %1205  ;;  %v1212_v62 = vpop.permute.xlu0 %1211 }
 0x32a   : > { %v1214_v4 = vpop.permute.xlu2 %1213  ;;  %v1221_v40 = vsel %vm836_vm8, %v1210_v35, %v1212_v62 }
 0x32b   : > { %v1222_v43 = vsel %vm836_vm8, %v1212_v62, %v1214_v4  ;;  %v1245_v10 = vsel %vm394_vm6, %v1221_v40, 0 }
 0x32c   : > { %v1248_v33 = vsel %vm394_vm6, %v1222_v43, 0 }
 0x331   : > { %v1208_v63 = vpop.permute.xlu1 %1207  ;;  %v1391_v5 = vpop.permute.xlu0 %1390 }
 0x332   : > { %v1219_v8 = vsel %vm836_vm8, %v1206_v58, %v1208_v63  ;;  %v1220_v29 = vsel %vm836_vm8, %v1208_v63, %v1210_v35  ;;  %v3770_v11 = vpop.permute.xlu2 %1362 }
 0x333   : > { %2873 = vmatmul.msk.bf16.vlgmr.msra.gmra.mxu1 %vm390_vm7, %v3629_v21  ;;  %2874 = vmatmul.msk.bf16.vlgmr.msra.gmra.mxu2 %vm390_vm7, %v3629_v21  ;;  %v1239_v9 = vsel %vm394_vm6, %v1219_v8, 0  ;;  %v1242_v45 = vsel %vm394_vm6, %v1220_v29, 0 }
 0x334   : > { %2875 = vmatmul.msk.bf16.vlgmr.msra.gmra.mxu3 %vm390_vm7, %v3629_v21  ;;  %2876 = vmatmul.msk.bf16.vlgmr.msrb.gmra.mxu0 %vm390_vm7, %v3629_v21 }
 0x335   : > { %1081 = vmatpush.bf16.msra.mxu2 %v1041_v15  ;;  %1094 = vmatpush.bf16.msra.mxu3 %v1044_v12 }
 0x336   : > { %1107 = vmatpush.bf16.msrb.mxu0 %v1047_v17  ;;  %1068 = vmatpush.bf16.msra.mxu1 %v1038_v16 }
 0x339   : > { %v1393_v30 = vpop.permute.xlu1 %1392  ;;  %v1387_v14 = vpop.permute.xlu0 %1386 }
 0x33a   : > { %v1395_v36 = vpop.permute.xlu2 %1394  ;;  %v1407_v37 = vsel %vm1404_vm9, %v1391_v5, %v1393_v30 }
 0x33b   : > { %v1408_v52 = vsel %vm1404_vm9, %v1393_v30, %v1395_v36 }
 0x341   : > { %v1389_v16 = vpop.permute.xlu1 %1388  ;;  %v1399_v51 = vpop.permute.xlu0 %1398 }
 0x342   : > { %v1405_v39 = vsel %vm1404_vm9, %v1387_v14, %v1389_v16  ;;  %v1397_v26 = vpop.permute.xlu2 %1396 }
 0x343   : > { %2877 = vmatmul.msk.bf16.vlgmr.msrb.gmra.mxu1 %vm390_vm7, %v3629_v21  ;;  %2878 = vmatmul.msk.bf16.vlgmr.msrb.gmra.mxu2 %vm390_vm7, %v3629_v21  ;;  %v1417_v56 = vsel %vm394_vm6, %v1405_v39, 0  ;;  %v1409_v35 = vsel %vm1404_vm9, %v1395_v36, %v1397_v26 }
 0x344   : > { %2879 = vmatmul.msk.bf16.vlgmr.msrb.gmra.mxu3 %vm390_vm7, %v3629_v21  ;;  %2880 = vmatmul.msk.bf16.vlgmr.msra.gmra.mxu0 %vm390_vm7, %v3629_v21  ;;  %v1218_v21 = vsel %vm836_vm8, %v1204_v20, %v1206_v58  ;;  %v1423_v20 = vsel %vm394_vm6, %v1407_v37, 0  ;;  %v1429_v63 = vsel %vm394_vm6, %v1409_v35, 0  ;;  %vm2401_vm8 = vsmask.f32 2304 }
 0x345   : > { %1120 = vmatpush.bf16.msrb.mxu1 %v1050_v23  ;;  %1133 = vmatpush.bf16.msrb.mxu2 %v1053_v28  ;;  %v1236_v61 = vsel %vm394_vm6, %v1218_v21, 0  ;;  %v1426_v28 = vsel %vm394_vm6, %v1408_v52, 0 }
 0x346   : > { %1146 = vmatpush.bf16.msrb.mxu3 %v1056_v24  ;;  %1159 = vmatpush.bf16.msra.mxu0 %v1059_v25 }
 0x349   : > { %v1401_v23 = vpop.permute.xlu1 %1400  ;;  %v1403_v57 = vpop.permute.xlu0 %1402 }
 0x350   : > { %v3729_v34 = vpop.f32.mrf.mxu1 }
 0x351   : > { %v3731_v19 = vpop.f32.mrf.mxu0  ;;  %v1581_v48 = vpop.permute.xlu1 %1580 }
 0x352   : > { %v3826_v4 = vpop.permute.xlu0 %1552 }
 0x353   : > { %2881 = vmatmul.msk.bf16.vlgmr.msra.gmra.mxu1 %vm390_vm7, %v3668_v7  ;;  %2882 = vmatmul.msk.bf16.vlgmr.msra.gmra.mxu2 %vm390_vm7, %v3668_v7 }
 0x354   : > { %2883 = vmatmul.msk.bf16.vlgmr.msra.gmra.mxu3 %vm390_vm7, %v3668_v7  ;;  %2884 = vmatmul.msk.bf16.vlgmr.msrb.gmra.mxu0 %vm390_vm7, %v3668_v7 }
 0x355   : > { %1270 = vmatpush.bf16.msra.mxu2 %v1230_v59  ;;  %1283 = vmatpush.bf16.msra.mxu3 %v1233_v49  ;;  %v1411_v49 = vsel %vm1404_vm9, %v1399_v51, %v1401_v23  ;;  %v1412_v59 = vsel %vm1404_vm9, %v1401_v23, %v1403_v57 }
 0x356   : > { %v3745_v0 = vpop.f32.mrf.mxu2  ;;  %1296 = vmatpush.bf16.msrb.mxu0 %v1236_v61  ;;  %1257 = vmatpush.bf16.msra.mxu1 %v1227_v60 }
 0x357   : > { %v3747_v1 = vpop.f32.mrf.mxu3 }
 0x358   : > { %v422_v2 = vpop.f32.mrf.mxu1 }
 0x359   : > { %v461_v3 = vpop.f32.mrf.mxu0  ;;  %v1435_v2 = vsel %vm394_vm6, %v1411_v49, 0 }
 0x35a   : > { %v1438_v3 = vsel %vm394_vm6, %v1412_v59, 0 }
 0x35e   : > { %v435_v6 = vpop.f32.mrf.mxu2 }
 0x35f   : > { %v448_v31 = vpop.f32.mrf.mxu3  ;;  %v1577_v6 = vpop.permute.xlu1 %1576 }
 0x360   : > { %v3754_v46 = vpop.f32.mrf.mxu1 }
 0x361   : > { %v3756_v44 = vpop.f32.mrf.mxu0 }
 0x363   : > { %2885 = vmatmul.msk.bf16.vlgmr.msrb.gmra.mxu1 %vm390_vm7, %v3668_v7  ;;  %2886 = vmatmul.msk.bf16.vlgmr.msrb.gmra.mxu2 %vm390_vm7, %v3668_v7 }
 0x364   : > { %2887 = vmatmul.msk.bf16.vlgmr.msrb.gmra.mxu3 %vm390_vm7, %v3668_v7  ;;  %2888 = vmatmul.msk.bf16.vlgmr.msra.gmra.mxu0 %vm390_vm7, %v3668_v7  ;;  %v1406_v7 = vsel %vm1404_vm9, %v1389_v16, %v1391_v5 }
 0x365   : > { %1309 = vmatpush.bf16.msrb.mxu1 %v1239_v9  ;;  %1322 = vmatpush.bf16.msrb.mxu2 %v1242_v45  ;;  %v1420_v55 = vsel %vm394_vm6, %v1406_v7, 0 }
 0x366   : > { %v3772_v13 = vpop.f32.mrf.mxu2  ;;  %1335 = vmatpush.bf16.msrb.mxu3 %v1245_v10  ;;  %1348 = vmatpush.bf16.msra.mxu0 %v1248_v33 }
 0x367   : > { %v3774_v12 = vpop.f32.mrf.mxu3  ;;  %v1589_v14 = vpop.permute.xlu1 %1588 }
 0x368   : > { %v474_v15 = vpop.f32.mrf.mxu1 }
 0x369   : > { %v513_v17 = vpop.f32.mrf.mxu0 }
 0x36e   : > { %v487_v27 = vpop.f32.mrf.mxu2 }
 0x36f   : > { %v500_v38 = vpop.f32.mrf.mxu3 }
 0x370   : > { %v554_v50 = vpop.f32.mrf.mxu1 }
 0x371   : > { %v3781_v53 = vadd.f32 %v554_v50, %v3729_v34  ;;  %v593_v18 = vpop.f32.mrf.mxu0 }
 0x372   : > { %v3786_v41 = vadd.f32 %v593_v18, %v3731_v19  ;;  %v1410_v19 = vsel %vm1404_vm9, %v1397_v26, %v1399_v51 }
 0x373   : > { %2889 = vmatmul.msk.bf16.vlgmr.msra.gmra.mxu1 %vm390_vm7, %v3708_v42  ;;  %2890 = vmatmul.msk.bf16.vlgmr.msra.gmra.mxu2 %vm390_vm7, %v3708_v42 }
 0x374   : > { %2891 = vmatmul.msk.bf16.vlgmr.msra.gmra.mxu3 %vm390_vm7, %v3708_v42  ;;  %2892 = vmatmul.msk.bf16.vlgmr.msrb.gmra.mxu0 %vm390_vm7, %v3708_v42 }
 0x375   : > { %1460 = vmatpush.bf16.msra.mxu2 %v1420_v55  ;;  %1473 = vmatpush.bf16.msra.mxu3 %v1423_v20  ;;  %v1593_v20 = vpop.permute.xlu1 %1592 }
 0x376   : > { %v567_v24 = vpop.f32.mrf.mxu2  ;;  %1486 = vmatpush.bf16.msrb.mxu0 %v1426_v28  ;;  %1447 = vmatpush.bf16.msra.mxu1 %v1417_v56 }
 0x377   : > { %v3799_v25 = vadd.f32 %v567_v24, %v3745_v0  ;;  %v580_v22 = vpop.f32.mrf.mxu3  ;;  %v1432_v0 = vsel %vm394_vm6, %v1410_v19, 0 }
 0x378   : > { %v3802_v47 = vadd.f32 %v580_v22, %v3747_v1  ;;  %v556_v58 = vpop.f32.mrf.mxu1  ;;  %v1583_v1 = vpop.permute.xlu2 %1582 }
 0x379   : > { %v595_v32 = vpop.f32.mrf.mxu0  ;;  %v1596_v9 = vsel %vm1404_vm9, %v1581_v48, %v1583_v1 }
 0x37a   : > { %v1612_v17 = vsel %vm394_vm6, %v1596_v9, 0 }
 0x37d   : > { %v3884_v35 = vpop.permute.xlu1 %1741 }
 0x37e   : > { %v569_v21 = vpop.f32.mrf.mxu2 }
 0x37f   : > { %v582_v34 = vpop.f32.mrf.mxu3 }
 0x380   : > { %v606_v60 = vpop.f32.mrf.mxu1  ;;  %v1579_v43 = vpop.permute.xlu2 %1578 }
 0x381   : > { %v3809_v61 = vadd.f32 %v606_v60, %v3754_v46  ;;  %v645_v62 = vpop.f32.mrf.mxu0  ;;  %v1585_v46 = vpop.permute.xlu0 %1584  ;;  %v1595_v45 = vsel %vm1404_vm9, %v1579_v43, %v1581_v48 }
 0x382   : > { %v3812_v54 = vadd.f32 %v645_v62, %v3756_v44  ;;  %v1597_v33 = vsel %vm1404_vm9, %v1583_v1, %v1585_v46  ;;  %v1609_v36 = vsel %vm394_vm6, %v1595_v45, 0 }
 0x383   : > { %2893 = vmatmul.msk.bf16.vlgmr.msrb.gmra.mxu1 %vm390_vm7, %v3708_v42  ;;  %2894 = vmatmul.msk.bf16.vlgmr.msrb.gmra.mxu2 %vm390_vm7, %v3708_v42  ;;  %v1615_v27 = vsel %vm394_vm6, %v1597_v33, 0 }
 0x384   : > { %2895 = vmatmul.msk.bf16.vlgmr.msrb.gmra.mxu3 %vm390_vm7, %v3708_v42  ;;  %2896 = vmatmul.msk.bf16.vlgmr.msra.gmra.mxu0 %vm390_vm7, %v3708_v42 }
 0x385   : > { %1499 = vmatpush.bf16.msrb.mxu1 %v1429_v63  ;;  %1512 = vmatpush.bf16.msrb.mxu2 %v1432_v0  ;;  %v1774_v0 = vpop.permute.xlu1 %1773 }
 0x386   : > { %v619_v5 = vpop.f32.mrf.mxu2  ;;  %1525 = vmatpush.bf16.msrb.mxu3 %v1435_v2  ;;  %1538 = vmatpush.bf16.msra.mxu0 %v1438_v3 }
 0x387   : > { %v3829_v8 = vadd.f32 %v619_v5, %v3772_v13  ;;  %v632_v29 = vpop.f32.mrf.mxu3  ;;  %v1594_v13 = vsel %vm1404_vm9, %v1577_v6, %v1579_v43 }
 0x388   : > { %v3832_v30 = vadd.f32 %v632_v29, %v3774_v12  ;;  %v608_v31 = vpop.f32.mrf.mxu1  ;;  %v1606_v37 = vsel %vm394_vm6, %v1594_v13, 0  ;;  %v1591_v7 = vpop.permute.xlu2 %1590 }
 0x389   : > { %v647_v40 = vpop.f32.mrf.mxu0  ;;  %v1600_v22 = vsel %vm1404_vm9, %v1589_v14, %v1591_v7 }
 0x38a   : > { %v1624_v21 = vsel %vm394_vm6, %v1600_v22, 0 }
 0x38e   : > { %v621_v42 = vpop.f32.mrf.mxu2 }
 0x38f   : > { %v634_v44 = vpop.f32.mrf.mxu3 }
 0x390   : > { %v691_v10 = vpop.f32.mrf.mxu1  ;;  %v1770_v28 = vpop.permute.xlu2 %1769 }
 0x391   : > { %v3839_v15 = vadd.f32 %v691_v10, %v3781_v53  ;;  %v730_v12 = vpop.f32.mrf.mxu0  ;;  %v1587_v53 = vpop.permute.xlu0 %1586 }
 0x392   : > { %v3842_v16 = vadd.f32 %v730_v12, %v3786_v41  ;;  %v1598_v56 = vsel %vm1404_vm9, %v1585_v46, %v1587_v53  ;;  %v1599_v23 = vsel %vm1404_vm9, %v1587_v53, %v1589_v14 }
 0x393   : > { %2897 = vmatmul.msk.bf16.vlgmr.msra.gmra.mxu1 %vm390_vm7, %v3770_v11  ;;  %2898 = vmatmul.msk.bf16.vlgmr.msra.gmra.mxu2 %vm390_vm7, %v3770_v11  ;;  %v1618_v32 = vsel %vm394_vm6, %v1598_v56, 0  ;;  %v1621_v57 = vsel %vm394_vm6, %v1599_v23, 0 }
 0x394   : > { %2899 = vmatmul.msk.bf16.vlgmr.msra.gmra.mxu3 %vm390_vm7, %v3770_v11  ;;  %2900 = vmatmul.msk.bf16.vlgmr.msrb.gmra.mxu0 %vm390_vm7, %v3770_v11 }
 0x395   : > { %1649 = vmatpush.bf16.msra.mxu2 %v1609_v36  ;;  %1662 = vmatpush.bf16.msra.mxu3 %v1612_v17 }
 0x396   : > { %v704_v38 = vpop.f32.mrf.mxu2  ;;  %1675 = vmatpush.bf16.msrb.mxu0 %v1615_v27  ;;  %1636 = vmatpush.bf16.msra.mxu1 %v1606_v37 }
 0x397   : > { %v3857_v39 = vadd.f32 %v704_v38, %v3799_v25  ;;  %v717_v50 = vpop.f32.mrf.mxu3  ;;  %v1601_v25 = vsel %vm1404_vm9, %v1591_v7, %v1593_v20 }
 0x398   : > { %v3860_v52 = vadd.f32 %v717_v50, %v3802_v47  ;;  %v693_v51 = vpop.f32.mrf.mxu1  ;;  %v1627_v34 = vsel %vm394_vm6, %v1601_v25, 0 }
 0x399   : > { %v732_v18 = vpop.f32.mrf.mxu0  ;;  %v1772_v48 = vpop.permute.xlu0 %1771 }
 0x39a   : > { %v1785_v2 = vsel %vm1404_vm9, %v1770_v28, %v1772_v48  ;;  %v1786_v6 = vsel %vm1404_vm9, %v1772_v48, %v1774_v0 }
 0x39b   : > { %v1801_v40 = vsel %vm394_vm6, %v1785_v2, 0  ;;  %v1804_v46 = vsel %vm394_vm6, %v1786_v6, 0 }
 0x39e   : > { %v706_v55 = vpop.f32.mrf.mxu2 }
 0x39f   : > { %v719_v41 = vpop.f32.mrf.mxu3 }
 0x3a0   : > { %v743_v24 = vpop.f32.mrf.mxu1 }
 0x3a1   : > { %v3867_v58 = vadd.f32 %v743_v24, %v3809_v61  ;;  %v782_v47 = vpop.f32.mrf.mxu0  ;;  %v1768_v63 = vpop.permute.xlu0 %1767 }
 0x3a2   : > { %v3870_v26 = vadd.f32 %v782_v47, %v3812_v54  ;;  %v1766_v54 = vpop.permute.xlu2 %1765  ;;  %v1784_v3 = vsel %vm1404_vm9, %v1768_v63, %v1770_v28 }
 0x3a3   : > { %2901 = vmatmul.msk.bf16.vlgmr.msrb.gmra.mxu1 %vm390_vm7, %v3770_v11  ;;  %2902 = vmatmul.msk.bf16.vlgmr.msrb.gmra.mxu2 %vm390_vm7, %v3770_v11  ;;  %v1798_v43 = vsel %vm394_vm6, %v1784_v3, 0 }
 0x3a4   : > { %2903 = vmatmul.msk.bf16.vlgmr.msrb.gmra.mxu3 %vm390_vm7, %v3770_v11  ;;  %2904 = vmatmul.msk.bf16.vlgmr.msra.gmra.mxu0 %vm390_vm7, %v3770_v11 }
 0x3a5   : > { %1688 = vmatpush.bf16.msrb.mxu1 %v1618_v32  ;;  %1701 = vmatpush.bf16.msrb.mxu2 %v1621_v57 }
 0x3a6   : > { %v756_v19 = vpop.f32.mrf.mxu2  ;;  %1714 = vmatpush.bf16.msrb.mxu3 %v1624_v21  ;;  %1727 = vmatpush.bf16.msra.mxu0 %v1627_v34 }
 0x3a7   : > { %v3887_v49 = vadd.f32 %v756_v19, %v3829_v8  ;;  %v769_v59 = vpop.f32.mrf.mxu3  ;;  %v1783_v8 = vsel %vm1404_vm9, %v1766_v54, %v1768_v63 }
 0x3a8   : > { %v3890_v60 = vadd.f32 %v769_v59, %v3832_v30  ;;  %v745_v61 = vpop.f32.mrf.mxu1  ;;  %v1795_v42 = vsel %vm394_vm6, %v1783_v8, 0 }
 0x3a9   : > { %v784_v62 = vpop.f32.mrf.mxu0  ;;  %v1780_v12 = vpop.permute.xlu0 %1779 }
 0x3aa   : > { %v1778_v44 = vpop.permute.xlu2 %1777 }
 0x3ab   : > { %v1789_v38 = vsel %vm1404_vm9, %v1778_v44, %v1780_v12 }
 0x3ac   : > { %v1813_v20 = vsel %vm394_vm6, %v1789_v38, 0 }
 0x3ae   : > { %v758_v11 = vpop.f32.mrf.mxu2 }
 0x3af   : > { %v771_v1 = vpop.f32.mrf.mxu3 }
 0x3b0   : > { %v881_v5 = vpop.f32.mrf.mxu1 }
 0x3b1   : > { %v976_v29 = vadd.f32 %v881_v5, %v3839_v15  ;;  %v920_v30 = vpop.f32.mrf.mxu0  ;;  %v1776_v15 = vpop.permute.xlu1 %1775 }
 0x3b2   : > { %v979_v31 = vadd.f32 %v920_v30, %v3842_v16  ;;  %v1782_v16 = vpop.permute.xlu2 %1781  ;;  %v1787_v27 = vsel %vm1404_vm9, %v1774_v0, %v1776_v15  ;;  %v1788_v37 = vsel %vm1404_vm9, %v1776_v15, %v1778_v44 }
 0x3b3   : > { %2905 = vmatmul.msk.bf16.vlgmr.msra.gmra.mxu1 %vm390_vm7, %v3826_v4  ;;  %2906 = vmatmul.msk.bf16.vlgmr.msra.gmra.mxu2 %vm390_vm7, %v3826_v4  ;;  %v1790_v50 = vsel %vm1404_vm9, %v1780_v12, %v1782_v16  ;;  %v1807_v53 = vsel %vm394_vm6, %v1787_v27, 0  ;;  %v1810_v18 = vsel %vm394_vm6, %v1788_v37, 0  ;;  %vm4199_vm9 = vmand %vm2400_vm5, %vm2401_vm8 }
 0x3b4   : > { %2907 = vmatmul.msk.bf16.vlgmr.msra.gmra.mxu3 %vm390_vm7, %v3826_v4  ;;  %2908 = vmatmul.msk.bf16.vlgmr.msrb.gmra.mxu0 %vm390_vm7, %v3826_v4  ;;  %v1816_v55 = vsel %vm394_vm6, %v1790_v50, 0  ;;  %vm2302_vm6 = vsmask.f32 7942 }
 0x3b5   : > { %1838 = vmatpush.bf16.msra.mxu2 %v1798_v43  ;;  %1851 = vmatpush.bf16.msra.mxu3 %v1801_v40  ;;  %vm4216_vm14 = vmand %vm2203_vm2, %vm2302_vm6 }
 0x3b6   : > { %v894_v9 = vpop.f32.mrf.mxu2  ;;  %1864 = vmatpush.bf16.msrb.mxu0 %v1804_v46  ;;  %1825 = vmatpush.bf16.msra.mxu1 %v1795_v42 }
 0x3b7   : > { %v977_v45 = vadd.f32 %v894_v9, %v3857_v39  ;;  %v907_v10 = vpop.f32.mrf.mxu3 }
 0x3b8   : > { %v978_v33 = vadd.f32 %v907_v10, %v3860_v52  ;;  %v883_v13 = vpop.f32.mrf.mxu1 }
 0x3b9   : > { %v922_v14 = vpop.f32.mrf.mxu0 }
 0x3be   : > { %v896_v17 = vpop.f32.mrf.mxu2 }
 0x3bf   : > { %v909_v36 = vpop.f32.mrf.mxu3 }
 0x3c0   : > { %v933_v7 = vpop.f32.mrf.mxu1 }
 0x3c1   : > { %v980_v39 = vadd.f32 %v933_v7, %v3867_v58  ;;  %v972_v51 = vpop.f32.mrf.mxu0 }
 0x3c2   : > { %v983_v52 = vadd.f32 %v972_v51, %v3870_v26 }
 0x3c3   : > { %2909 = vmatmul.msk.bf16.vlgmr.msrb.gmra.mxu1 %vm390_vm7, %v3826_v4  ;;  %2910 = vmatmul.msk.bf16.vlgmr.msrb.gmra.mxu2 %vm390_vm7, %v3826_v4 }
 0x3c4   : > { %2911 = vmatmul.msk.bf16.vlgmr.msrb.gmra.mxu3 %vm390_vm7, %v3826_v4  ;;  %2912 = vmatmul.msk.bf16.vlgmr.msra.gmra.mxu0 %vm390_vm7, %v3826_v4 }
 0x3c5   : > { %1877 = vmatpush.bf16.msrb.mxu1 %v1807_v53  ;;  %1890 = vmatpush.bf16.msrb.mxu2 %v1810_v18 }
 0x3c6   : > { %v946_v41 = vpop.f32.mrf.mxu2  ;;  %1903 = vmatpush.bf16.msrb.mxu3 %v1813_v20  ;;  %1916 = vmatpush.bf16.msra.mxu0 %v1816_v55 }
 0x3c7   : > { %v981_v56 = vadd.f32 %v946_v41, %v3887_v49  ;;  %v959_v23 = vpop.f32.mrf.mxu3 }
 0x3c8   : > { %v982_v28 = vadd.f32 %v959_v23, %v3890_v60  ;;  %v935_v24 = vpop.f32.mrf.mxu1 }
 0x3c9   : > { %v974_v22 = vpop.f32.mrf.mxu0 }
 0x3ce   : > { %v948_v25 = vpop.f32.mrf.mxu2 }
 0x3cf   : > { %v961_v58 = vpop.f32.mrf.mxu3 }
 0x3d0   : > { %v1070_v47 = vpop.f32.mrf.mxu1 }
 0x3d1   : > { %v1165_v26 = vadd.f32 %v1070_v47, %v976_v29  ;;  %v1109_v32 = vpop.f32.mrf.mxu0 }
 0x3d2   : > { %v1168_v57 = vadd.f32 %v1109_v32, %v979_v31 }
 0x3d3   : > { %2913 = vmatmul.msk.bf16.vlgmr.msra.gmra.mxu1 %vm390_vm7, %v3884_v35  ;;  %2914 = vmatmul.msk.bf16.vlgmr.msra.gmra.mxu2 %vm390_vm7, %v3884_v35 }
 0x3d4   : > { %2915 = vmatmul.msk.bf16.vlgmr.msra.gmra.mxu3 %vm390_vm7, %v3884_v35  ;;  %2916 = vmatmul.msk.bf16.vlgmr.msrb.gmra.mxu0 %vm390_vm7, %v3884_v35 }
 0x3d6   : > { %v1083_v4 = vpop.f32.mrf.mxu2 }
 0x3d7   : > { %v1166_v48 = vadd.f32 %v1083_v4, %v977_v45  ;;  %v1096_v21 = vpop.f32.mrf.mxu3 }
 0x3d8   : > { %v1167_v34 = vadd.f32 %v1096_v21, %v978_v33  ;;  %v1072_v19 = vpop.f32.mrf.mxu1 }
 0x3d9   : > { %v1111_v49 = vpop.f32.mrf.mxu0 }
 0x3de   : > { %v1085_v59 = vpop.f32.mrf.mxu2 }
 0x3df   : > { %v1098_v60 = vpop.f32.mrf.mxu3 }
 0x3e0   : > { %v1122_v61 = vpop.f32.mrf.mxu1 }
 0x3e1   : > { %v1169_v62 = vadd.f32 %v1122_v61, %v980_v39  ;;  %v1161_v54 = vpop.f32.mrf.mxu0 }
 0x3e2   : > { %v1172_v63 = vadd.f32 %v1161_v54, %v983_v52 }
 0x3e3   : > { %2917 = vmatmul.msk.bf16.vlgmr.msrb.gmra.mxu1 %vm390_vm7, %v3884_v35  ;;  %2918 = vmatmul.msk.bf16.vlgmr.msrb.gmra.mxu2 %vm390_vm7, %v3884_v35 }
 0x3e4   : > { %2919 = vmatmul.msk.bf16.vlgmr.msrb.gmra.mxu3 %vm390_vm7, %v3884_v35  ;;  %2920 = vmatmul.msk.bf16.vlgmr.msra.gmra.mxu0 %vm390_vm7, %v3884_v35  ;;  %vm4141_vm7 = vmand %vm2203_vm2, %vm2204_vm3 }
 0x3e5   : > { %vm4353_vm2 = vmand %vm2400_vm5, %vm2499_vm15 }
 0x3e6   : > { %v1135_v0 = vpop.f32.mrf.mxu2 }
 0x3e7   : > { %v1170_v11 = vadd.f32 %v1135_v0, %v981_v56  ;;  %v1148_v1 = vpop.f32.mrf.mxu3 }
 0x3e8   : > { %v1171_v2 = vadd.f32 %v1148_v1, %v982_v28  ;;  %v1124_v3 = vpop.f32.mrf.mxu1 }
 0x3e9   : > { %v1163_v5 = vpop.f32.mrf.mxu0 }
 0x3ee   : > { %v1137_v6 = vpop.f32.mrf.mxu2 }
 0x3ef   : > { %v1150_v8 = vpop.f32.mrf.mxu3 }
 0x3f0   : > { %v1259_v29 = vpop.f32.mrf.mxu1 }
 0x3f1   : > { %v3948_v30 = vadd.f32 %v1259_v29, %v1165_v26  ;;  %v1298_v31 = vpop.f32.mrf.mxu0 }
 0x3f2   : > { %v1357_v40 = vadd.f32 %v1298_v31, %v1168_v57 }
 0x3f6   : > { %v1272_v43 = vpop.f32.mrf.mxu2 }
 0x3f7   : > { %v1355_v46 = vadd.f32 %v1272_v43, %v1166_v48  ;;  %v1285_v42 = vpop.f32.mrf.mxu3 }
 0x3f8   : > { %v1356_v44 = vadd.f32 %v1285_v42, %v1167_v34  ;;  %v1261_v9 = vpop.f32.mrf.mxu1 }
 0x3f9   : > { %v1300_v45 = vpop.f32.mrf.mxu0 }
 0x3fa   : > { %v3255_v45 = vmov 286326784  }
 0x3fe   : > { %v1274_v35 = vpop.f32.mrf.mxu2 }
 0x3ff   : > { %v1287_v10 = vpop.f32.mrf.mxu3  ;;  %v1967_v35 = vunpack.c.l.s4 %v3255_v45 }
 0x400   : > { %v1311_v33 = vpop.f32.mrf.mxu1 }
 0x401   : > { %v1358_v13 = vadd.f32 %v1311_v33, %v1169_v62  ;;  %v1350_v14 = vpop.f32.mrf.mxu0 }
 0x402   : > { %v1361_v15 = vadd.f32 %v1350_v14, %v1172_v63  ;;  %v3974_v14 = vunpack.c.0.s8 %v1967_v35 }
 0x406   : > { %v1324_v12 = vpop.f32.mrf.mxu2 }
 0x407   : > { %v1359_v16 = vadd.f32 %v1324_v12, %v1170_v11  ;;  %v1337_v17 = vpop.f32.mrf.mxu3 }
 0x408   : > { %v1360_v36 = vadd.f32 %v1337_v17, %v1171_v2  ;;  %v1313_v27 = vpop.f32.mrf.mxu1 }
 0x409   : > { %v1352_v37 = vpop.f32.mrf.mxu0 }
 0x40e   : > { %v1326_v7 = vpop.f32.mrf.mxu2 }
 0x40f   : > { %v1339_v38 = vpop.f32.mrf.mxu3 }
 0x410   : > { %v1449_v50 = vpop.f32.mrf.mxu1 }
 0x411   : > { %v1488_v39 = vpop.f32.mrf.mxu0  ;;  %v1544_v31 = vadd.f32 %v1449_v50, %v3948_v30 }
 0x412   : > { %v1547_v51 = vadd.f32 %v1488_v39, %v1357_v40 }
 0x416   : > { %v1462_v52 = vpop.f32.mrf.mxu2 }
 0x417   : > { %v3950_v53 = vadd.f32 %v1462_v52, %v1355_v46  ;;  %v1475_v18 = vpop.f32.mrf.mxu3 }
 0x418   : > { %v3952_v20 = vadd.f32 %v1475_v18, %v1356_v44  ;;  %v1451_v55 = vpop.f32.mrf.mxu1 }
 0x419   : > { %v1490_v41 = vpop.f32.mrf.mxu0 }
 0x41e   : > { %v1464_v56 = vpop.f32.mrf.mxu2 }
 0x41f   : > { %v1477_v23 = vpop.f32.mrf.mxu3 }
 0x420   : > { %v1501_v28 = vpop.f32.mrf.mxu1 }
 0x421   : > { %v3954_v24 = vadd.f32 %v1501_v28, %v1358_v13  ;;  %v1540_v22 = vpop.f32.mrf.mxu0 }
 0x422   : > { %v1551_v25 = vadd.f32 %v1540_v22, %v1361_v15 }
 0x426   : > { %v1514_v58 = vpop.f32.mrf.mxu2 }
 0x427   : > { %v1549_v47 = vadd.f32 %v1514_v58, %v1359_v16  ;;  %v1527_v26 = vpop.f32.mrf.mxu3 }
 0x428   : > { %v1550_v32 = vadd.f32 %v1527_v26, %v1360_v36  ;;  %v1503_v57 = vpop.f32.mrf.mxu1 }
 0x429   : > { %v1542_v4 = vpop.f32.mrf.mxu0  ;;  %v2012_v57 = vld [vmem:[%s3996_s6 + $0x4] sm:$0x1] }
 0x42e   : > { %v1516_v48 = vpop.f32.mrf.mxu2 }
 0x42f   : > { %v1529_v21 = vpop.f32.mrf.mxu3 }
 0x430   : > { %v1638_v34 = vpop.f32.mrf.mxu1 }
 0x431   : > { %v1677_v19 = vpop.f32.mrf.mxu0  ;;  %v1733_v43 = vadd.f32 %v1638_v34, %v1544_v31 }
 0x432   : > { %v1736_v49 = vadd.f32 %v1677_v19, %v1547_v51  ;;  %v2015_v19 = vld [vmem:[%s3996_s6 + $0x8] sm:$0x1] }
 0x436   : > { %v3956_v59 = vpop.f32.mrf.mxu2 }
 0x437   : > { %v3958_v60 = vpop.f32.mrf.mxu3 }
 0x438   : > { %v1640_v61 = vpop.f32.mrf.mxu1 }
 0x439   : > { %v1679_v62 = vpop.f32.mrf.mxu0 }
 0x43e   : > { %v1653_v54 = vpop.f32.mrf.mxu2 }
 0x43f   : > { %v1666_v63 = vpop.f32.mrf.mxu3 }
 0x440   : > { %v3960_v0 = vpop.f32.mrf.mxu1 }
 0x441   : > { %v1729_v11 = vpop.f32.mrf.mxu0 }
 0x442   : > { %v3962_v1 = vadd.f32 %v1729_v11, %v1551_v25  ;;  %v2009_v25 = vld [vmem:[%s3996_s6] sm:$0x1]  ;;  %v2018_v11 = vld [vmem:[%s3996_s6 + $0xc] sm:$0x1] }
 0x446   : > { %v1703_v2 = vpop.f32.mrf.mxu2 }
 0x447   : > { %v3964_v3 = vadd.f32 %v1703_v2, %v1549_v47  ;;  %v1716_v5 = vpop.f32.mrf.mxu3  ;;  %v2024_v2 = vld [vmem:[%s3996_s6 + $0x14] sm:$0x1] }
 0x448   : > { %v3966_v6 = vadd.f32 %v1716_v5, %v1550_v32  ;;  %v1692_v8 = vpop.f32.mrf.mxu1 }
 0x449   : > { %v1731_v29 = vpop.f32.mrf.mxu0 }
 0x44e   : > { %v1705_v40 = vpop.f32.mrf.mxu2 }
 0x44f   : > { %v1718_v46 = vpop.f32.mrf.mxu3  ;;  %v2027_v40 = vld [vmem:[%s3996_s6 + $0x18] sm:$0x1] }
 0x450   : > { %v1827_v42 = vpop.f32.mrf.mxu1 }
 0x451   : > { %v1922_v44 = vadd.f32 %v1827_v42, %v1733_v43  ;;  %v1866_v9 = vpop.f32.mrf.mxu0 }
 0x452   : > { %v1925_v10 = vadd.f32 %v1866_v9, %v1736_v49  ;;  %v2021_v49 = vld [vmem:[%s3996_s6 + $0x10] sm:$0x1] }
 0x453   : > { %v1930_v33 = vpack.c.bf16 %v1922_v44, %v1922_v44  ;;  %v2030_v44 = vld [vmem:[%s3996_s6 + $0x1c] sm:$0x1] }
 0x454   : > { %v3972_v13 = vpack.c.bf16 %v1925_v10, %v1925_v10 }
 0x455   : > { %v1932_v30 = vrot.slane %v1930_v33, 3 }
 0x456   : > { %v3977_v15 = vrot.slane %v3972_v13, 3  ;;  %v3979_v12 = vpop.f32.mrf.mxu2 }
 0x457   : > { %v1936_v16 = vsel %vm1933_vm10, %v1930_v33, %v1932_v30  ;;  %v1939_v17 = vsel %vm1938_vm11, %v1930_v33, %v1932_v30  ;;  %v1943_v36 = vsel %vm1942_vm12, %v1930_v33, %v1932_v30  ;;  %v1947_v27 = vsel %vm1946_vm13, %v1930_v33, %v1932_v30  ;;  %v3985_v37 = vpop.f32.mrf.mxu3 }
 0x458   : > { %v1941_v7 = vrot.slane %v1939_v17, 1  ;;  %v1945_v38 = vrot.slane %v1943_v36, 2  ;;  %v1949_v50 = vrot.slane %v1947_v27, 3  ;;  %v1951_v39 = vunpack.i.h.s16 %v1936_v16  ;;  %v1829_v51 = vpop.f32.mrf.mxu1 }
 0x459   : > { %v2921_v52 = vpack.i.b16 %v1936_v16, %v1936_v16  ;;  %v2237_v18 = vsel %vm1938_vm11, %v3972_v13, %v3977_v15  ;;  %v1868_v55 = vpop.f32.mrf.mxu0  ;;  %v2240_v9 = vsel %vm1942_vm12, %v3972_v13, %v3977_v15  ;;  %v1734_v16 = vadd.f32 %v3956_v59, %v3950_v53 }
 0x45a   : > { %v1953_v41 = vunpack.i.h.s16 %v1941_v7  ;;  %v1955_v56 = vunpack.i.h.s16 %v1945_v38  ;;  %v1957_v23 = vunpack.i.h.s16 %v1949_v50  ;;  %v1959_v28 = vpack.i.b16 %v1951_v39, %v1951_v39 }
 0x45b   : > { %v2922_v58 = vpack.i.b16 %v1941_v7, %v1941_v7  ;;  %v2923_v47 = vpack.i.b16 %v1945_v38, %v1945_v38  ;;  %v2924_v26 = vpack.i.b16 %v1949_v50, %v1949_v50  ;;  %v1969_v32 = vperm.slane %v2921_v52, %v3974_v14 }
 0x45c   : > { %v1961_v4 = vpack.i.b16 %v1953_v41, %v1953_v41  ;;  %v1963_v48 = vpack.i.b16 %v1955_v56, %v1955_v56  ;;  %v1965_v21 = vpack.i.b16 %v1957_v23, %v1957_v23  ;;  %v1973_v34 = vperm.slane %v1959_v28, %v3974_v14 }
 0x45d   : > { %v1977_v61 = vperm.slane %v2922_v58, %v3974_v14  ;;  %v1985_v62 = vperm.slane %v2923_v47, %v3974_v14  ;;  %v1993_v54 = vperm.slane %v2924_v26, %v3974_v14  ;;  %v2010_v63 = vsel %vm3992_vm0, %v1969_v32, %v2009_v25 }
 0x45e   : > { %v1981_v5 = vperm.slane %v1961_v4, %v3974_v14  ;;  %v1989_v8 = vperm.slane %v1963_v48, %v3974_v14  ;;  %v1997_v29 = vperm.slane %v1965_v21, %v3974_v14  ;;  %2011 = vst [vmem:[%s3996_s6] sm:$0x1] %v2010_v63  ;;  %v2013_v31 = vsel %vm3992_vm0, %v1973_v34, %v2012_v57  ;;  %v1842_v43 = vpop.f32.mrf.mxu2 }
 0x45f   : > { %2014 = vst [vmem:[%s3996_s6 + $0x4] sm:$0x1] %v2013_v31  ;;  %v2016_v46 = vsel %vm3992_vm0, %v1977_v61, %v2015_v19  ;;  %v2022_v42 = vsel %vm3992_vm0, %v1985_v62, %v2021_v49  ;;  %v1855_v45 = vpop.f32.mrf.mxu3  ;;  %v4032_v33 = vrot.slane %v2237_v18, 1  ;;  %v2028_v17 = vsel %vm3992_vm0, %v1993_v54, %v2027_v40 }
 0x460   : > { %2017 = vst [vmem:[%s3996_s6 + $0x8] sm:$0x1] %v2016_v46  ;;  %v2019_v35 = vsel %vm3992_vm0, %v1981_v5, %v2018_v11  ;;  %v2025_v10 = vsel %vm3992_vm0, %v1989_v8, %v2024_v2  ;;  %v1879_v30 = vpop.f32.mrf.mxu1  ;;  %v2235_v36 = vsel %vm1933_vm10, %v3972_v13, %v3977_v15  ;;  %v2031_v7 = vsel %vm3992_vm0, %v1997_v29, %v2030_v44  ;;  %v2206_v11 = vld [vmem:[%s3996_s6] sm:$0x2] }
 0x461   : > { %2020 = vst [vmem:[%s3996_s6 + $0xc] sm:$0x1] %v2019_v35  ;;  %v4042_v27 = vpop.f32.mrf.mxu0  ;;  %v4047_v38 = vrot.slane %v2240_v9, 2  ;;  %v2243_v53 = vsel %vm1946_vm13, %v3972_v13, %v3977_v15  ;;  %v1923_v59 = vadd.f32 %v3979_v12, %v1734_v16  ;;  %v1735_v50 = vadd.f32 %v3958_v60, %v3952_v20 }
 0x462   : > { %2023 = vst [vmem:[%s3996_s6 + $0x10] sm:$0x1] %v2022_v42  ;;  %v2247_v39 = vunpack.i.h.s16 %v2235_v36  ;;  %v2249_v51 = vunpack.i.h.s16 %v4032_v33  ;;  %v2933_v52 = vpack.i.b16 %v2235_v36, %v2235_v36  ;;  %v1737_v18 = vadd.f32 %v3960_v0, %v3954_v24 }
 0x463   : > { %2026 = vst [vmem:[%s3996_s6 + $0x14] sm:$0x1] %v2025_v10  ;;  %v2033_v55 = vpack.c.bf16 %v1923_v59, %v1923_v59  ;;  %v4061_v41 = vrot.slane %v2243_v53, 3  ;;  %v2251_v56 = vunpack.i.h.s16 %v4047_v38  ;;  %v1924_v13 = vadd.f32 %v3985_v37, %v1735_v50 }
 0x464   : > { %2029 = vst [vmem:[%s3996_s6 + $0x18] sm:$0x1] %v2028_v17  ;;  %v2934_v20 = vpack.i.b16 %v4032_v33, %v4032_v33  ;;  %v2935_v60 = vpack.i.b16 %v4047_v38, %v4047_v38  ;;  %v1926_v12 = vadd.f32 %v1879_v30, %v1737_v18  ;;  %v4071_v24 = vpack.i.b16 %v2247_v39, %v2247_v39 }
 0x465   : > { %2032 = vst [vmem:[%s3996_s6 + $0x1c] sm:$0x1] %v2031_v7  ;;  %v2035_v15 = vrot.slane %v2033_v55, 3  ;;  %v4073_v0 = vpack.i.b16 %v2249_v51, %v2249_v51  ;;  %v4076_v28 = vperm.slane %v2933_v52, %v3974_v14  ;;  %v2131_v22 = vpack.c.bf16 %v1924_v13, %v1924_v13  ;;  %v2107_v2 = vld [vmem:[%s3996_s6] sm:$0x1] }
 0x466   : > { %v4069_v23 = vpop.f32.mrf.mxu2  ;;  %v4082_v49 = vpack.c.bf16 %v1926_v12, %v1926_v12  ;;  %v2110_v40 = vld [vmem:[%s3996_s6 + $0x4] sm:$0x1]  ;;  %vm2597_vm0 = vcmask 125955  }
 0x467   : > { %v2038_v37 = vsel %vm1933_vm10, %v2033_v55, %v2035_v15  ;;  %v2040_v58 = vsel %vm1938_vm11, %v2033_v55, %v2035_v15  ;;  %v2043_v47 = vsel %vm1942_vm12, %v2033_v55, %v2035_v15  ;;  %v2046_v26 = vsel %vm1946_vm13, %v2033_v55, %v2035_v15  ;;  %v2113_v9 = vld [vmem:[%s3996_s6 + $0x8] sm:$0x1]  ;;  %v4097_v10 = vpop.f32.mrf.mxu3 }
 0x468   : > { %v1881_v25 = vpop.f32.mrf.mxu1  ;;  %v2042_v57 = vrot.slane %v2040_v58, 1  ;;  %v2045_v4 = vrot.slane %v2043_v47, 2  ;;  %v2048_v48 = vrot.slane %v2046_v26, 3  ;;  %v2050_v21 = vunpack.i.h.s16 %v2038_v37  ;;  %v2116_v7 = vld [vmem:[%s3996_s6 + $0xc] sm:$0x1] }
 0x469   : > { %v1920_v32 = vpop.f32.mrf.mxu0  ;;  %v2925_v34 = vpack.i.b16 %v2038_v37, %v2038_v37  ;;  %v2133_v19 = vrot.slane %v2131_v22, 3  ;;  %v2119_v45 = vld [vmem:[%s3996_s6 + $0x10] sm:$0x1] }
 0x46a   : > { %v2052_v61 = vunpack.i.h.s16 %v2042_v57  ;;  %v2054_v62 = vunpack.i.h.s16 %v2045_v4  ;;  %v2056_v54 = vunpack.i.h.s16 %v2048_v48  ;;  %v2058_v63 = vpack.i.b16 %v2050_v21, %v2050_v21  ;;  %v2122_v53 = vld [vmem:[%s3996_s6 + $0x14] sm:$0x1] }
 0x46b   : > { %v2926_v5 = vpack.i.b16 %v2042_v57, %v2042_v57  ;;  %v2927_v8 = vpack.i.b16 %v2045_v4, %v2045_v4  ;;  %v2928_v29 = vpack.i.b16 %v2048_v48, %v2048_v48  ;;  %v2068_v31 = vperm.slane %v2925_v34, %v3974_v14  ;;  %v2125_v35 = vld [vmem:[%s3996_s6 + $0x18] sm:$0x1] }
 0x46c   : > { %v2060_v43 = vpack.i.b16 %v2052_v61, %v2052_v61  ;;  %v2062_v46 = vpack.i.b16 %v2054_v62, %v2054_v62  ;;  %v2064_v42 = vpack.i.b16 %v2056_v54, %v2056_v54  ;;  %v2072_v44 = vperm.slane %v2058_v63, %v3974_v14  ;;  %v2128_v59 = vld [vmem:[%s3996_s6 + $0x1c] sm:$0x1] }
 0x46d   : > { %v2076_v30 = vperm.slane %v2926_v5, %v3974_v14  ;;  %v2084_v16 = vperm.slane %v2927_v8, %v3974_v14  ;;  %v2092_v17 = vperm.slane %v2928_v29, %v3974_v14  ;;  %v2108_v36 = vsel %vm4086_vm4, %v2068_v31, %v2107_v2  ;;  %v2209_v31 = vld [vmem:[%s3996_s6 + $0x4] sm:$0x2] }
 0x46e   : > { %v1894_v50 = vpop.f32.mrf.mxu2  ;;  %v2080_v39 = vperm.slane %v2060_v43, %v3974_v14  ;;  %v2088_v51 = vperm.slane %v2062_v46, %v3974_v14  ;;  %v2096_v52 = vperm.slane %v2064_v42, %v3974_v14  ;;  %2109 = vst [vmem:[%s3996_s6] sm:$0x1] %v2108_v36  ;;  %v2111_v18 = vsel %vm4086_vm4, %v2072_v44, %v2110_v40  ;;  %v2212_v40 = vld [vmem:[%s3996_s6 + $0x8] sm:$0x2]  ;;  %v2218_v44 = vld [vmem:[%s3996_s6 + $0x10] sm:$0x2] }
 0x46f   : > { %2112 = vst [vmem:[%s3996_s6 + $0x4] sm:$0x1] %v2111_v18  ;;  %v2114_v55 = vsel %vm4086_vm4, %v2076_v30, %v2113_v9  ;;  %v2120_v13 = vsel %vm4086_vm4, %v2084_v16, %v2119_v45  ;;  %v2126_v15 = vsel %vm4086_vm4, %v2092_v17, %v2125_v35  ;;  %v2136_v12 = vsel %vm1933_vm10, %v2131_v22, %v2133_v19  ;;  %v1907_v43 = vpop.f32.mrf.mxu3  ;;  %v2215_v16 = vld [vmem:[%s3996_s6 + $0xc] sm:$0x2]  ;;  %v2224_v50 = vld [vmem:[%s3996_s6 + $0x18] sm:$0x2] }
 0x470   : > { %2115 = vst [vmem:[%s3996_s6 + $0x8] sm:$0x1] %v2114_v55  ;;  %v2117_v25 = vsel %vm4086_vm4, %v2080_v39, %v2116_v7  ;;  %v2123_v37 = vsel %vm4086_vm4, %v2088_v51, %v2122_v53  ;;  %v2129_v58 = vsel %vm4086_vm4, %v2096_v52, %v2128_v59  ;;  %v2138_v47 = vsel %vm1938_vm11, %v2131_v22, %v2133_v19  ;;  %v2221_v59 = vld [vmem:[%s3996_s6 + $0x14] sm:$0x2]  ;;  %v2227_v55 = vld [vmem:[%s3996_s6 + $0x1c] sm:$0x2] }
 0x471   : > { %2118 = vst [vmem:[%s3996_s6 + $0xc] sm:$0x1] %v2117_v25  ;;  %v2140_v26 = vrot.slane %v2138_v47, 1  ;;  %v2141_v32 = vsel %vm1942_vm12, %v2131_v22, %v2133_v19  ;;  %v2144_v57 = vsel %vm1946_vm13, %v2131_v22, %v2133_v19  ;;  %v2148_v4 = vunpack.i.h.s16 %v2136_v12 }
 0x472   : > { %2121 = vst [vmem:[%s3996_s6 + $0x10] sm:$0x1] %v2120_v13  ;;  %v2143_v48 = vrot.slane %v2141_v32, 2  ;;  %v2146_v21 = vrot.slane %v2144_v57, 3  ;;  %v2929_v34 = vpack.i.b16 %v2136_v12, %v2136_v12  ;;  %v2330_v61 = vrot.slane %v4082_v49, 3 }
 0x473   : > { %2124 = vst [vmem:[%s3996_s6 + $0x14] sm:$0x1] %v2123_v37  ;;  %v2150_v62 = vunpack.i.h.s16 %v2140_v26  ;;  %v2156_v54 = vpack.i.b16 %v2148_v4, %v2148_v4  ;;  %v2930_v63 = vpack.i.b16 %v2140_v26, %v2140_v26  ;;  %v1929_v22 = vadd.f32 %v4042_v27, %v3962_v1 }
 0x474   : > { %2127 = vst [vmem:[%s3996_s6 + $0x18] sm:$0x1] %v2126_v15  ;;  %v2152_v19 = vunpack.i.h.s16 %v2143_v48  ;;  %v2154_v2 = vunpack.i.h.s16 %v2146_v21  ;;  %v2931_v5 = vpack.i.b16 %v2143_v48, %v2143_v48  ;;  %v2932_v8 = vpack.i.b16 %v2146_v21, %v2146_v21 }
 0x475   : > { %2130 = vst [vmem:[%s3996_s6 + $0x1c] sm:$0x1] %v2129_v58  ;;  %v2158_v46 = vpack.i.b16 %v2150_v62, %v2150_v62  ;;  %v2166_v1 = vperm.slane %v2929_v34, %v3974_v14  ;;  %v2170_v27 = vperm.slane %v2156_v54, %v3974_v14  ;;  %v2174_v42 = vperm.slane %v2930_v63, %v3974_v14 }
 0x476   : > { %v2160_v9 = vpack.i.b16 %v2152_v19, %v2152_v19  ;;  %v2162_v45 = vpack.i.b16 %v2154_v2, %v2154_v2  ;;  %v2182_v35 = vperm.slane %v2931_v5, %v3974_v14  ;;  %v2190_v30 = vperm.slane %v2932_v8, %v3974_v14 }
 0x477   : > { %v2178_v17 = vperm.slane %v2158_v46, %v3974_v14  ;;  %v2207_v36 = vsel %vm4141_vm7, %v2166_v1, %v2206_v11  ;;  %v2210_v7 = vsel %vm4141_vm7, %v2170_v27, %v2209_v31  ;;  %v2213_v53 = vsel %vm4141_vm7, %v2174_v42, %v2212_v40 }
 0x478   : > { %v2186_v39 = vperm.slane %v2160_v9, %v3974_v14  ;;  %v2194_v51 = vperm.slane %v2162_v45, %v3974_v14  ;;  %2208 = vst [vmem:[%s3996_s6] sm:$0x2] %v2207_v36  ;;  %v2219_v52 = vsel %vm4141_vm7, %v2182_v35, %v2218_v44  ;;  %v2333_v13 = vsel %vm1933_vm10, %v4082_v49, %v2330_v61 }
 0x479   : > { %2211 = vst [vmem:[%s3996_s6 + $0x4] sm:$0x2] %v2210_v7  ;;  %v2216_v18 = vsel %vm4141_vm7, %v2178_v17, %v2215_v16  ;;  %v2335_v15 = vsel %vm1938_vm11, %v4082_v49, %v2330_v61  ;;  %v2338_v12 = vsel %vm1942_vm12, %v4082_v49, %v2330_v61  ;;  %v2225_v37 = vsel %vm4141_vm7, %v2190_v30, %v2224_v50  ;;  %v2406_v7 = vld [vmem:[%s3996_s6 + $0x4] sm:$0x4] }
 0x47a   : > { %2214 = vst [vmem:[%s3996_s6 + $0x8] sm:$0x2] %v2213_v53  ;;  %v2222_v25 = vsel %vm4141_vm7, %v2186_v39, %v2221_v59  ;;  %v2337_v58 = vrot.slane %v2335_v15, 1  ;;  %v4184_v47 = vrot.slane %v2338_v12, 2  ;;  %v2341_v26 = vsel %vm1946_vm13, %v4082_v49, %v2330_v61  ;;  %v2403_v61 = vld [vmem:[%s3996_s6] sm:$0x4] }
 0x47b   : > { %2217 = vst [vmem:[%s3996_s6 + $0xc] sm:$0x2] %v2216_v18  ;;  %v2345_v32 = vunpack.i.h.s16 %v2333_v13  ;;  %v2937_v57 = vpack.i.b16 %v2333_v13, %v2333_v13  ;;  %v4189_v4 = vpack.c.bf16 %v1929_v22, %v1929_v22  ;;  %v2253_v48 = vunpack.i.h.s16 %v4061_v41 }
 0x47c   : > { %2220 = vst [vmem:[%s3996_s6 + $0x10] sm:$0x2] %v2219_v52  ;;  %v2228_v21 = vsel %vm4141_vm7, %v2194_v51, %v2227_v55  ;;  %v4195_v34 = vrot.slane %v2341_v26, 3  ;;  %v2347_v62 = vunpack.i.h.s16 %v2337_v58  ;;  %v2259_v54 = vpack.i.b16 %v2251_v56, %v2251_v56  ;;  %v2409_v51 = vld [vmem:[%s3996_s6 + $0x8] sm:$0x4] }
 0x47d   : > { %v2936_v63 = vpack.i.b16 %v4061_v41, %v4061_v41  ;;  %v2273_v11 = vperm.slane %v2934_v20, %v3974_v14  ;;  %2223 = vst [vmem:[%s3996_s6 + $0x14] sm:$0x2] %v2222_v25  ;;  %v2363_v19 = vperm.slane %v2937_v57, %v3974_v14  ;;  %v2269_v56 = vperm.slane %v4071_v24, %v3974_v14  ;;  %v2412_v25 = vld [vmem:[%s3996_s6 + $0xc] sm:$0x4] }
 0x47e   : > { %v2277_v41 = vperm.slane %v4073_v0, %v3974_v14  ;;  %2226 = vst [vmem:[%s3996_s6 + $0x18] sm:$0x2] %v2225_v37  ;;  %v2349_v33 = vunpack.i.h.s16 %v4184_v47  ;;  %v2353_v20 = vpack.i.b16 %v2345_v32, %v2345_v32  ;;  %v2351_v5 = vunpack.i.h.s16 %v4195_v34  ;;  %v2415_v32 = vld [vmem:[%s3996_s6 + $0x10] sm:$0x4] }
 0x47f   : > { %2229 = vst [vmem:[%s3996_s6 + $0x1c] sm:$0x2] %v2228_v21  ;;  %v2304_v2 = vld [vmem:[%s3996_s6] sm:$0x2]  ;;  %v2938_v8 = vpack.i.b16 %v2337_v58, %v2337_v58  ;;  %v2404_v29 = vsel %vm4199_vm9, %v2363_v19, %v2403_v61  ;;  %v4233_v24 = vrot.slane %v4189_v4, 3  ;;  %v2261_v0 = vpack.i.b16 %v2253_v48, %v2253_v48 }
 0x480   : > { %v2281_v31 = vperm.slane %v2935_v60, %v3974_v14  ;;  %v2305_v40 = vsel %vm4216_vm14, %v4076_v28, %v2304_v2  ;;  %v2307_v43 = vld [vmem:[%s3996_s6 + $0x4] sm:$0x2]  ;;  %v2355_v46 = vpack.i.b16 %v2347_v62, %v2347_v62  ;;  %2405 = vst [vmem:[%s3996_s6] sm:$0x4] %v2404_v29  ;;  %v2285_v1 = vperm.slane %v2259_v54, %v3974_v14  ;;  %v2421_v54 = vld [vmem:[%s3996_s6 + $0x18] sm:$0x4] }
 0x481   : > { %v2289_v27 = vperm.slane %v2936_v63, %v3974_v14  ;;  %2306 = vst [vmem:[%s3996_s6] sm:$0x2] %v2305_v40  ;;  %v2308_v42 = vsel %vm4216_vm14, %v2269_v56, %v2307_v43  ;;  %v2310_v38 = vld [vmem:[%s3996_s6 + $0x8] sm:$0x2]  ;;  %v2939_v60 = vpack.i.b16 %v4184_v47, %v4184_v47  ;;  %v2357_v9 = vpack.i.b16 %v2349_v33, %v2349_v33 }
 0x482   : > { %2309 = vst [vmem:[%s3996_s6 + $0x4] sm:$0x2] %v2308_v42  ;;  %v2311_v28 = vsel %vm4216_vm14, %v2273_v11, %v2310_v38  ;;  %v2313_v44 = vld [vmem:[%s3996_s6 + $0xc] sm:$0x2]  ;;  %v2940_v45 = vpack.i.b16 %v4195_v34, %v4195_v34  ;;  %v2367_v35 = vperm.slane %v2353_v20, %v3974_v14  ;;  %v2359_v17 = vpack.i.b16 %v2351_v5, %v2351_v5  ;;  %v2418_v34 = vld [vmem:[%s3996_s6 + $0x14] sm:$0x4] }
 0x483   : > { %2312 = vst [vmem:[%s3996_s6 + $0x8] sm:$0x2] %v2311_v28  ;;  %v2314_v30 = vsel %vm4216_vm14, %v2277_v41, %v2313_v44  ;;  %v2316_v16 = vld [vmem:[%s3996_s6 + $0x10] sm:$0x2]  ;;  %v2371_v36 = vperm.slane %v2938_v8, %v3974_v14  ;;  %v4268_v53 = vsel %vm1933_vm10, %v4189_v4, %v4233_v24  ;;  %v2375_v39 = vperm.slane %v2355_v46, %v3974_v14  ;;  %v2424_v11 = vld [vmem:[%s3996_s6 + $0x1c] sm:$0x4] }
 0x484   : > { %2315 = vst [vmem:[%s3996_s6 + $0xc] sm:$0x2] %v2314_v30  ;;  %v2317_v59 = vsel %vm4216_vm14, %v2281_v31, %v2316_v16  ;;  %v2319_v50 = vld [vmem:[%s3996_s6 + $0x14] sm:$0x2]  ;;  %v2631_v52 = vsel %vm1938_vm11, %v4189_v4, %v4233_v24  ;;  %v2634_v18 = vsel %vm1942_vm12, %v4189_v4, %v4233_v24  ;;  %v2293_v55 = vperm.slane %v2261_v0, %v3974_v14 }
 0x485   : > { %2318 = vst [vmem:[%s3996_s6 + $0x10] sm:$0x2] %v2317_v59  ;;  %v2320_v13 = vsel %vm4216_vm14, %v2285_v1, %v2319_v50  ;;  %v2322_v15 = vld [vmem:[%s3996_s6 + $0x18] sm:$0x2]  ;;  %v2379_v12 = vperm.slane %v2939_v60, %v3974_v14  ;;  %v2383_v47 = vperm.slane %v2357_v9, %v3974_v14  ;;  %v2407_v26 = vsel %vm4199_vm9, %v2367_v35, %v2406_v7  ;;  %v2615_v9 = vld [vmem:[%s3996_s6 + $0x14] sm:$0x8] }
 0x486   : > { %2321 = vst [vmem:[%s3996_s6 + $0x14] sm:$0x2] %v2320_v13  ;;  %v2323_v37 = vsel %vm4216_vm14, %v2289_v27, %v2322_v15  ;;  %v2325_v58 = vld [vmem:[%s3996_s6 + $0x1c] sm:$0x2]  ;;  %v2387_v48 = vperm.slane %v2940_v45, %v3974_v14  ;;  %v2410_v21 = vsel %vm4199_vm9, %v2371_v36, %v2409_v51  ;;  %v2391_v62 = vperm.slane %v2359_v17, %v3974_v14 }
 0x487   : > { %2324 = vst [vmem:[%s3996_s6 + $0x18] sm:$0x2] %v2323_v37  ;;  %v2326_v57 = vsel %vm4216_vm14, %v2293_v55, %v2325_v58  ;;  %v2413_v61 = vsel %vm4199_vm9, %v2375_v39, %v2412_v25  ;;  %v2416_v63 = vsel %vm4199_vm9, %v2379_v12, %v2415_v32  ;;  %v2419_v22 = vsel %vm4199_vm9, %v2383_v47, %v2418_v34  ;;  %v2501_v45 = vld [vmem:[%s3996_s6] sm:$0x4] }
 0x488   : > { %2327 = vst [vmem:[%s3996_s6 + $0x1c] sm:$0x2] %v2326_v57  ;;  %v2422_v19 = vsel %vm4199_vm9, %v2387_v48, %v2421_v54  ;;  %v1927_v56 = vadd.f32 %v4069_v23, %v3964_v3  ;;  %v2425_v41 = vsel %vm4199_vm9, %v2391_v62, %v2424_v11  ;;  %v1928_v33 = vadd.f32 %v4097_v10, %v3966_v6 }
 0x489   : > { %2408 = vst [vmem:[%s3996_s6 + $0x4] sm:$0x4] %v2407_v26  ;;  %v2637_v20 = vsel %vm1946_vm13, %v4189_v4, %v4233_v24  ;;  %v4334_v8 = vrot.slane %v2631_v52, 1  ;;  %v4336_v23 = vrot.slane %v2634_v18, 2 }
 0x48a   : > { %2411 = vst [vmem:[%s3996_s6 + $0x8] sm:$0x4] %v2410_v21  ;;  %v2427_v2 = vpack.c.bf16 %v1927_v56, %v1927_v56  ;;  %v4331_v5 = vpack.c.bf16 %v1928_v33, %v1928_v33  ;;  %v4338_v49 = vrot.slane %v2637_v20, 3 }
 0x48b   : > { %2414 = vst [vmem:[%s3996_s6 + $0xc] sm:$0x4] %v2413_v61 }
 0x48c   : > { %2417 = vst [vmem:[%s3996_s6 + $0x10] sm:$0x4] %v2416_v63  ;;  %v2429_v3 = vrot.slane %v2427_v2, 3  ;;  %v2527_v6 = vrot.slane %v4331_v5, 3 }
 0x48d   : > { %2420 = vst [vmem:[%s3996_s6 + $0x14] sm:$0x4] %v2419_v22 }
 0x48e   : > { %2423 = vst [vmem:[%s3996_s6 + $0x18] sm:$0x4] %v2422_v19  ;;  %v2432_v10 = vsel %vm1933_vm10, %v2427_v2, %v2429_v3  ;;  %v2434_v29 = vsel %vm1938_vm11, %v2427_v2, %v2429_v3  ;;  %v2437_v4 = vsel %vm1942_vm12, %v2427_v2, %v2429_v3  ;;  %v2440_v24 = vsel %vm1946_vm13, %v2427_v2, %v2429_v3 }
 0x48f   : > { %2426 = vst [vmem:[%s3996_s6 + $0x1c] sm:$0x4] %v2425_v41  ;;  %v2436_v0 = vrot.slane %v2434_v29, 1  ;;  %v2439_v31 = vrot.slane %v2437_v4, 2  ;;  %v2442_v40 = vrot.slane %v2440_v24, 3  ;;  %v2444_v43 = vunpack.i.h.s16 %v2432_v10 }
 0x490   : > { %v2941_v46 = vpack.i.b16 %v2432_v10, %v2432_v10  ;;  %v2530_v1 = vsel %vm1933_vm10, %v4331_v5, %v2527_v6  ;;  %v2532_v27 = vsel %vm1938_vm11, %v4331_v5, %v2527_v6  ;;  %v2535_v42 = vsel %vm1942_vm12, %v4331_v5, %v2527_v6  ;;  %v2504_v36 = vld [vmem:[%s3996_s6 + $0x4] sm:$0x4]  ;;  %vm4398_vm10 = vmand %vm2597_vm0, %vm2598_vm1 }
 0x491   : > { %v2446_v38 = vunpack.i.h.s16 %v2436_v0  ;;  %v2448_v60 = vunpack.i.h.s16 %v2439_v31  ;;  %v2450_v28 = vunpack.i.h.s16 %v2442_v40  ;;  %v2452_v44 = vpack.i.b16 %v2444_v43, %v2444_v43  ;;  %v2507_v51 = vld [vmem:[%s3996_s6 + $0x8] sm:$0x4] }
 0x492   : > { %v2942_v35 = vpack.i.b16 %v2436_v0, %v2436_v0  ;;  %v2943_v30 = vpack.i.b16 %v2439_v31, %v2439_v31  ;;  %v2944_v16 = vpack.i.b16 %v2442_v40, %v2442_v40  ;;  %v2462_v17 = vperm.slane %v2941_v46, %v3974_v14  ;;  %v2510_v25 = vld [vmem:[%s3996_s6 + $0xc] sm:$0x4]  ;;  %v2603_v0 = vld [vmem:[%s3996_s6 + $0x4] sm:$0x8]  ;;  %v2606_v31 = vld [vmem:[%s3996_s6 + $0x8] sm:$0x8] }
 0x493   : > { %v2454_v7 = vpack.i.b16 %v2446_v38, %v2446_v38  ;;  %v2456_v59 = vpack.i.b16 %v2448_v60, %v2448_v60  ;;  %v2458_v50 = vpack.i.b16 %v2450_v28, %v2450_v28  ;;  %v2466_v39 = vperm.slane %v2452_v44, %v3974_v14  ;;  %v2513_v52 = vld [vmem:[%s3996_s6 + $0x10] sm:$0x4] }
 0x494   : > { %v2470_v55 = vperm.slane %v2942_v35, %v3974_v14  ;;  %v2478_v13 = vperm.slane %v2943_v30, %v3974_v14  ;;  %v2486_v15 = vperm.slane %v2944_v16, %v3974_v14  ;;  %v2502_v12 = vsel %vm4353_vm2, %v2462_v17, %v2501_v45  ;;  %v2516_v37 = vld [vmem:[%s3996_s6 + $0x14] sm:$0x4]  ;;  %v2618_v17 = vld [vmem:[%s3996_s6 + $0x18] sm:$0x8] }
 0x495   : > { %v2519_v18 = vld [vmem:[%s3996_s6 + $0x18] sm:$0x4]  ;;  %v2474_v47 = vperm.slane %v2454_v7, %v3974_v14  ;;  %v2482_v26 = vperm.slane %v2456_v59, %v3974_v14  ;;  %v2490_v32 = vperm.slane %v2458_v50, %v3974_v14  ;;  %2503 = vst [vmem:[%s3996_s6] sm:$0x4] %v2502_v12  ;;  %v2505_v57 = vsel %vm4353_vm2, %v2466_v39, %v2504_v36  ;;  %v2621_v39 = vld [vmem:[%s3996_s6 + $0x1c] sm:$0x8] }
 0x496   : > { %v2522_v58 = vld [vmem:[%s3996_s6 + $0x1c] sm:$0x4]  ;;  %2506 = vst [vmem:[%s3996_s6 + $0x4] sm:$0x4] %v2505_v57  ;;  %v2508_v48 = vsel %vm4353_vm2, %v2470_v55, %v2507_v51  ;;  %v2514_v21 = vsel %vm4353_vm2, %v2478_v13, %v2513_v52  ;;  %v2520_v34 = vsel %vm4353_vm2, %v2486_v15, %v2519_v18  ;;  %v2534_v62 = vrot.slane %v2532_v27, 1 }
 0x497   : > { %2509 = vst [vmem:[%s3996_s6 + $0x8] sm:$0x4] %v2508_v48  ;;  %v2511_v61 = vsel %vm4353_vm2, %v2474_v47, %v2510_v25  ;;  %v2517_v54 = vsel %vm4353_vm2, %v2482_v26, %v2516_v37  ;;  %v2523_v63 = vsel %vm4353_vm2, %v2490_v32, %v2522_v58  ;;  %v2537_v11 = vrot.slane %v2535_v42, 2  ;;  %v2609_v27 = vld [vmem:[%s3996_s6 + $0xc] sm:$0x8] }
 0x498   : > { %2512 = vst [vmem:[%s3996_s6 + $0xc] sm:$0x4] %v2511_v61  ;;  %v2538_v22 = vsel %vm1946_vm13, %v4331_v5, %v2527_v6  ;;  %v2542_v19 = vunpack.i.h.s16 %v2530_v1  ;;  %v2544_v56 = vunpack.i.h.s16 %v2534_v62  ;;  %v2945_v41 = vpack.i.b16 %v2530_v1, %v2530_v1  ;;  %v2600_v5 = vld [vmem:[%s3996_s6] sm:$0x8]  ;;  %v2612_v42 = vld [vmem:[%s3996_s6 + $0x10] sm:$0x8] }
 0x499   : > { %2515 = vst [vmem:[%s3996_s6 + $0x10] sm:$0x4] %v2514_v21  ;;  %v2540_v33 = vrot.slane %v2538_v22, 3  ;;  %v2546_v20 = vunpack.i.h.s16 %v2537_v11  ;;  %v2946_v2 = vpack.i.b16 %v2534_v62, %v2534_v62  ;;  %v2947_v3 = vpack.i.b16 %v2537_v11, %v2537_v11 }
 0x49a   : > { %v2641_v6 = vunpack.i.h.s16 %v4268_v53  ;;  %2518 = vst [vmem:[%s3996_s6 + $0x14] sm:$0x4] %v2517_v54  ;;  %v2550_v29 = vpack.i.b16 %v2542_v19, %v2542_v19  ;;  %v2552_v4 = vpack.i.b16 %v2544_v56, %v2544_v56  ;;  %v2560_v24 = vperm.slane %v2945_v41, %v3974_v14 }
 0x49b   : > { %2521 = vst [vmem:[%s3996_s6 + $0x18] sm:$0x4] %v2520_v34  ;;  %v2548_v40 = vunpack.i.h.s16 %v2540_v33  ;;  %v2554_v43 = vpack.i.b16 %v2546_v20, %v2546_v20  ;;  %v2948_v46 = vpack.i.b16 %v2540_v33, %v2540_v33  ;;  %v2568_v1 = vperm.slane %v2946_v2, %v3974_v14 }
 0x49c   : > { %2524 = vst [vmem:[%s3996_s6 + $0x1c] sm:$0x4] %v2523_v63  ;;  %v2564_v38 = vperm.slane %v2550_v29, %v3974_v14  ;;  %v2572_v60 = vperm.slane %v2552_v4, %v3974_v14  ;;  %v2576_v28 = vperm.slane %v2947_v3, %v3974_v14  ;;  %v2601_v44 = vsel %vm4398_vm10, %v2560_v24, %v2600_v5 }
 0x49d   : > { %v2556_v45 = vpack.i.b16 %v2548_v40, %v2548_v40  ;;  %v2580_v35 = vperm.slane %v2554_v43, %v3974_v14  ;;  %v2584_v30 = vperm.slane %v2948_v46, %v3974_v14  ;;  %2602 = vst [vmem:[%s3996_s6] sm:$0x8] %v2601_v44  ;;  %v2607_v16 = vsel %vm4398_vm10, %v2568_v1, %v2606_v31 }
 0x49e   : > { %v2643_v36 = vunpack.i.h.s16 %v4334_v8  ;;  %v2604_v7 = vsel %vm4398_vm10, %v2564_v38, %v2603_v0  ;;  %2608 = vst [vmem:[%s3996_s6 + $0x8] sm:$0x8] %v2607_v16  ;;  %v2610_v59 = vsel %vm4398_vm10, %v2572_v60, %v2609_v27  ;;  %v2613_v50 = vsel %vm4398_vm10, %v2576_v28, %v2612_v42 }
 0x49f   : > { %v2949_v51 = vpack.i.b16 %v4268_v53, %v4268_v53  ;;  %v2588_v52 = vperm.slane %v2556_v45, %v3974_v14  ;;  %2605 = vst [vmem:[%s3996_s6 + $0x4] sm:$0x8] %v2604_v7  ;;  %v2616_v18 = vsel %vm4398_vm10, %v2580_v35, %v2615_v9  ;;  %vm2696_vm11 = vsmask.f32 7950 }
 0x4a0   : > { %v2645_v55 = vunpack.i.h.s16 %v4336_v23  ;;  %v2950_v13 = vpack.i.b16 %v4334_v8, %v4334_v8  ;;  %2611 = vst [vmem:[%s3996_s6 + $0xc] sm:$0x8] %v2610_v59  ;;  %v2619_v15 = vsel %vm4398_vm10, %v2584_v30, %v2618_v17  ;;  %v2649_v53 = vpack.i.b16 %v2641_v6, %v2641_v6  ;;  %vm4456_vm12 = vmand %vm2597_vm0, %vm2696_vm11 }
 0x4a1   : > { %2614 = vst [vmem:[%s3996_s6 + $0x10] sm:$0x8] %v2613_v50  ;;  %v2622_v12 = vsel %vm4398_vm10, %v2588_v52, %v2621_v39  ;;  %v2647_v25 = vunpack.i.h.s16 %v4338_v49  ;;  %v2651_v37 = vpack.i.b16 %v2643_v36, %v2643_v36  ;;  %v2951_v58 = vpack.i.b16 %v4336_v23, %v4336_v23 }
 0x4a2   : > { %2617 = vst [vmem:[%s3996_s6 + $0x14] sm:$0x8] %v2616_v18  ;;  %v2659_v47 = vperm.slane %v2949_v51, %v3974_v14  ;;  %v2653_v26 = vpack.i.b16 %v2645_v55, %v2645_v55  ;;  %v2667_v32 = vperm.slane %v2950_v13, %v3974_v14  ;;  %v2952_v23 = vpack.i.b16 %v4338_v49, %v4338_v49 }
 0x4a3   : > { %2620 = vst [vmem:[%s3996_s6 + $0x18] sm:$0x8] %v2619_v15  ;;  %v2663_v48 = vperm.slane %v2649_v53, %v3974_v14  ;;  %v2655_v62 = vpack.i.b16 %v2647_v25, %v2647_v25  ;;  %v2671_v61 = vperm.slane %v2651_v37, %v3974_v14  ;;  %v2675_v49 = vperm.slane %v2951_v58, %v3974_v14 }
 0x4a4   : > { %2623 = vst [vmem:[%s3996_s6 + $0x1c] sm:$0x8] %v2622_v12  ;;  %v2698_v57 = vld [vmem:[%s3996_s6] sm:$0x8]  ;;  %v2679_v19 = vperm.slane %v2653_v26, %v3974_v14  ;;  %v2683_v33 = vperm.slane %v2952_v23, %v3974_v14 }
 0x4a5   : > { %v2699_v21 = vsel %vm4456_vm12, %v2659_v47, %v2698_v57  ;;  %v2704_v34 = vld [vmem:[%s3996_s6 + $0x8] sm:$0x8]  ;;  %v2687_v3 = vperm.slane %v2655_v62, %v3974_v14 }
 0x4a6   : > { %2700 = vst [vmem:[%s3996_s6] sm:$0x8] %v2699_v21  ;;  %v2701_v54 = vld [vmem:[%s3996_s6 + $0x4] sm:$0x8]  ;;  %v2705_v63 = vsel %vm4456_vm12, %v2667_v32, %v2704_v34 }
 0x4a7   : > { %v2702_v11 = vsel %vm4456_vm12, %v2663_v48, %v2701_v54  ;;  %2706 = vst [vmem:[%s3996_s6 + $0x8] sm:$0x8] %v2705_v63  ;;  %v2707_v22 = vld [vmem:[%s3996_s6 + $0xc] sm:$0x8] }
 0x4a8   : > { %2703 = vst [vmem:[%s3996_s6 + $0x4] sm:$0x8] %v2702_v11  ;;  %v2708_v56 = vsel %vm4456_vm12, %v2671_v61, %v2707_v22  ;;  %v2710_v41 = vld [vmem:[%s3996_s6 + $0x10] sm:$0x8] }
 0x4a9   : > { %2709 = vst [vmem:[%s3996_s6 + $0xc] sm:$0x8] %v2708_v56  ;;  %v2711_v20 = vsel %vm4456_vm12, %v2675_v49, %v2710_v41  ;;  %v2713_v2 = vld [vmem:[%s3996_s6 + $0x14] sm:$0x8] }
 0x4aa   : > { %2712 = vst [vmem:[%s3996_s6 + $0x10] sm:$0x8] %v2711_v20  ;;  %v2714_v10 = vsel %vm4456_vm12, %v2679_v19, %v2713_v2  ;;  %v2716_v5 = vld [vmem:[%s3996_s6 + $0x18] sm:$0x8] }
 0x4ab   : > { %2715 = vst [vmem:[%s3996_s6 + $0x14] sm:$0x8] %v2714_v10  ;;  %v2717_v6 = vsel %vm4456_vm12, %v2683_v33, %v2716_v5  ;;  %v2719_v29 = vld [vmem:[%s3996_s6 + $0x1c] sm:$0x8] }
 0x4ac   : > { %2718 = vst [vmem:[%s3996_s6 + $0x18] sm:$0x8] %v2717_v6  ;;  %v2720_v4 = vsel %vm4456_vm12, %v2687_v3, %v2719_v29 }
 0x4ad   : > { %2721 = vst [vmem:[%s3996_s6 + $0x1c] sm:$0x8] %v2720_v4 }
 0x4ae   : > { %3147 = shalt.err (!%p3144_p1)
}
 0x4af   : > { %s3256_s29 = smov 64   ;;  %s3257_s6 = smov 128  }
 0x4b0   : > { %s3258_s10 = smov 4  }
 0x4b1   : > { %2971 = dma.vmem_to_hbm [thread:$0]  (%p3371_p12), %s4500_s14, 512, %s2739_s23, %s2723_s9, %s3256_s29, %s3257_s6, %s3258_s10  }
 0x4b2 PF: > { %p2982_p4 = scmp.ge.s32.totalorder %s3242_s28, 2  ;;  %s2753_s24 = sand.u32 1, %s3202_s18  }
 0x4b3   : > { %s2754_s25 = scalar_lea.sflag [#allocation4], %s2753_s24 }
 0x4b4   : > { %p2978_p5 = pnand %p2982_p4, %p3384_p2 }
 0x4b6   : > { %p2979_p6 = pneg %p2978_p5 }
 0x4b8   : > { %3197 = dma.done.wait (%p2979_p6), %s2754_s25, 512  }
 0x4b9   : > { %3199 = vsyncadd (%p2979_p6), %s2754_s25, 4294966784  ;;  %s21_s28 = sadd.s32 1, %s3242_s28   ;;  %s4602_s15 = sld [smem:[#allocation8_spill]] }
 0x4ba   : > { %p18_p8 = scmp.ge.s32.totalorder %s21_s28, 6   ;;  %s4603_s23 = sld [smem:[#allocation13_spill]] }
 0x4bb   : > { %s4604_s24 = sld [smem:[#allocation9_spill]]  ;;  %s4608_s18 = smov %s3206_s19 }
 0x4bc   : > { %s4605_s25 = sld [smem:[#allocation10_spill]]  ;;  %s4609_s19 = smov %s3210_s20 }
 0x4bd   : > { %s4606_s26 = sld [smem:[#allocation11_spill]]  ;;  %s4610_s20 = smov %s3379_s17 }
 0x4be   : > { %s4607_s27 = sld [smem:[#allocation12_spill]]  ;;  %s4611_s21 = smov %s3218_s22 }
 0x4bf   : > { %s4612_s22 = smov %s4602_s15  ;;  %20 = sbr.rel (!%p18_p8) target bundleno = 9 (0x9), region = 101 }
 0x4c4   :  { %2760 = vsyncpa [#allocation3], 1 }
 0x4c5   :  { %2762 = vsyncpa [#allocation3 + $0x1], 1 }
 0x4c6   :  { %2763 = vsyncpa [#allocation4], 1 }
 0x4c7   :  { %2765 = vsyncpa [#allocation4 + $0x1], 1 }

</bundles_post_ra>
